<compile_context>
chip_gen: v7x
topology: tpu7x:2x2x1
jax: 0.10.0
libtpu: 0.0.40
codegen_flags: <defaults>
</compile_context>

<pallas_src>
import math
import functools

import jax
import jax.numpy as jnp
from jax import lax
from jax.experimental import pallas as pl
from jax.experimental.pallas import tpu as pltpu


def _round_up(x, m):
    return (x + m - 1) // m * m


def _aspp_kernel(x_ref, w_ref, bias_ref, o_ref, *, kh, kw, dilation, h_out, w_out):
    """One batch image: dilated conv (KH*KW shifted matmuls) + folded BN + ReLU.

    x_ref:    (Hp, Wp, Cin_p)          spatially zero-padded, channels-last
    w_ref:    (KH*KW, Cin_p, Cout_p)   BN-scale-folded weight taps, (in, out)
    bias_ref: (1, Cout_p)              folded BN bias = beta - mean * scale
    o_ref:    (H_out*W_out, Cout_p)    f32, lane-dense; doubles as accumulator
    """
    cin = x_ref.shape[-1]
    first = True
    for i in range(kh):                      # static, fully unrolled (KH*KW taps)
        for j in range(kw):
            xs = x_ref[i * dilation:i * dilation + h_out,
                       j * dilation:j * dilation + w_out, :]
            xs2 = xs.reshape(h_out * w_out, cin)
            tap = jnp.dot(xs2, w_ref[i * kw + j],
                          preferred_element_type=jnp.float32)
            if first:
                o_ref[...] = tap
                first = False
            else:
                o_ref[...] += tap
    # Epilogue: folded-BN bias add + ReLU (scale already folded into weights).
    o_ref[...] = jnp.maximum(o_ref[...] + bias_ref[0], 0.0)


def aspp_forward(x_nchw, weight, bn_gamma, bn_beta, bn_mean, bn_var, *,
                 padding, dilation, eps=1e-5, compute_dtype=jnp.float32):
    """Fused _ASPPModule forward.

    x_nchw: (B, Cin, H, W) float32 (PyTorch layout)
    weight: (Cout, Cin, KH, KW) float32 (PyTorch Conv2d layout, bias=False)
    bn_*:   (Cout,) BatchNorm2d affine params + running stats (eval mode).
    """
    B, Cin, H, W = x_nchw.shape
    Cout, Cin_w, KH, KW = weight.shape
    assert Cin_w == Cin, "weight Cin mismatch"

    # Output spatial size (stride = 1, as in the module).
    H_out = H + 2 * padding - dilation * (KH - 1)
    W_out = W + 2 * padding - dilation * (KW - 1)
    Hp, Wp = H + 2 * padding, W + 2 * padding

    # Lane/sublane-friendly channel padding.
    cin_p = _round_up(Cin, 8)
    cout_p = _round_up(Cout, 128)

    # Channels-last + conv zero padding + channel padding (host-side, one-time).
    x = jnp.transpose(x_nchw, (0, 2, 3, 1))                       # (B, H, W, Cin)
    x_p = jnp.pad(x, ((0, 0), (padding, padding), (padding, padding),
                      (0, cin_p - Cin))).astype(compute_dtype)    # (B, Hp, Wp, Cin_p)

    # Fold BatchNorm (eval mode): y = conv(x, W) * s + b  ==  conv(x, W*s) + b.
    # TODO(synk): training-mode BatchNorm (batch statistics over B,H,W) is not
    # implemented in-kernel; eval-mode running stats are folded instead.
    scale = bn_gamma * lax.rsqrt(bn_var + eps)                    # (Cout,)
    bias = bn_beta - bn_mean * scale                              # (Cout,)

    # Weight -> (KH*KW, Cin_p, Cout_p), (in, out) layout, BN scale pre-folded.
    w = jnp.transpose(weight, (2, 3, 1, 0)) * scale[None, None, None, :]
    w = jnp.pad(w, ((0, 0), (0, 0), (0, cin_p - Cin), (0, cout_p - Cout)))
    w = w.reshape(KH * KW, cin_p, cout_p).astype(compute_dtype)

    bias_p = jnp.pad(bias, (0, cout_p - Cout)).reshape(1, cout_p).astype(jnp.float32)

    kernel = functools.partial(_aspp_kernel, kh=KH, kw=KW, dilation=dilation,
                               h_out=H_out, w_out=W_out)

    itemsize = jnp.dtype(compute_dtype).itemsize
    cost = pl.CostEstimate(
        flops=2 * B * H_out * W_out * cin_p * cout_p * KH * KW,
        transcendentals=0,
        bytes_accessed=(B * Hp * Wp * cin_p * itemsize
                        + KH * KW * cin_p * cout_p * itemsize
                        + B * H_out * W_out * cout_p * 4),
    )

    out = pl.pallas_call(
        kernel,
        out_shape=jax.ShapeDtypeStruct((B, H_out * W_out, cout_p), jnp.float32),
        grid=(B,),
        in_specs=[
            # batch dim squeezed out of the kernel view
            pl.BlockSpec((None, Hp, Wp, cin_p), lambda b: (b, 0, 0, 0)),
            # constant index_map -> weights / bias stay resident across grid
            pl.BlockSpec((KH * KW, cin_p, cout_p), lambda b: (0, 0, 0)),
            pl.BlockSpec((1, cout_p), lambda b: (0, 0)),
        ],
        out_specs=pl.BlockSpec((None, H_out * W_out, cout_p), lambda b: (b, 0, 0)),
        compiler_params=pltpu.CompilerParams(
            dimension_semantics=("parallel",)),
        cost_estimate=cost,
    )(x_p, w, bias_p)

    # Un-flatten spatial dims, strip channel padding, back to PyTorch NCHW.
    out = out[..., :Cout].reshape(B, H_out, W_out, Cout)
    return jnp.transpose(out, (0, 3, 1, 2))


def aspp_ref(x_nchw, weight, gamma, beta, mean, var, *, padding, dilation, eps=1e-5):
    """Pure-JAX reference: dilated conv -> eval-mode BN -> ReLU."""
    y = lax.conv_general_dilated(
        x_nchw, weight,
        window_strides=(1, 1),
        padding=((padding, padding), (padding, padding)),
        rhs_dilation=(dilation, dilation),
        dimension_numbers=("NCHW", "OIHW", "NCHW"))
    scale = gamma * lax.rsqrt(var + eps)
    bias = beta - mean * scale
    y = y * scale[None, :, None, None] + bias[None, :, None, None]
    return jnp.maximum(y, 0.0)


def _make_params(key, cin, cout, k):
    k2, k3, k4 = jax.random.split(key, 3)
    fan_in = cin * k * k
    weight = jax.random.normal(k2, (cout, cin, k, k), jnp.float32) * math.sqrt(2.0 / fan_in)
    gamma = jnp.ones((cout,), jnp.float32)
    beta = jnp.zeros((cout,), jnp.float32)
    run_mean = 0.1 * jax.random.normal(k3, (cout,), jnp.float32)
    run_var = jnp.abs(jax.random.normal(k4, (cout,), jnp.float32)) + 0.5
    return weight, gamma, beta, run_mean, run_var


if __name__ == "__main__":
    # Small shapes consistent with _ASPPModule(inplanes, planes, 3, padding=d, dilation=d)
    B, Cin, H, W = 2, 8, 16, 16
    Cout = 16

    key = jax.random.PRNGKey(0)
    kx, kw3, kw1 = jax.random.split(key, 3)
    x = jax.random.normal(kx, (B, Cin, H, W), jnp.float32)

    max_err = 0.0

    # 3x3 dilated ASPP branch: padding == dilation -> same spatial size.
    K, dil, pad = 3, 2, 2
    w3, g3, b3, m3, v3 = _make_params(kw3, Cin, Cout, K)
    out3 = jax.block_until_ready(
        aspp_forward(x, w3, g3, b3, m3, v3, padding=pad, dilation=dil))
    ref3 = jax.block_until_ready(
        aspp_ref(x, w3, g3, b3, m3, v3, padding=pad, dilation=dil))
    max_err = max(max_err, float(jnp.max(jnp.abs(out3 - ref3))))

    # 1x1 ASPP branch: kernel_size=1, padding=0, dilation=1 (same kernel, generic taps).
    w1, g1, b1, m1, v1 = _make_params(kw1, Cin, Cout, 1)
    out1 = jax.block_until_ready(
        aspp_forward(x, w1, g1, b1, m1, v1, padding=0, dilation=1))
    ref1 = jax.block_until_ready(
        aspp_ref(x, w1, g1, b1, m1, v1, padding=0, dilation=1))
    max_err = max(max_err, float(jnp.max(jnp.abs(out1 - ref1))))

    if max_err > 1e-3:
        print(f"WARNING: max abs error vs reference = {max_err}")

    print("KERNEL_OK")
</pallas_src>

<mosaic_0001>
module attributes {stable_mosaic.version = 11 : i64} {
  func.func @_aspp_kernel(%arg0: i32, %arg1: memref<1x20x20x8xf32, #tpu.memory_space<vmem>>, %arg2: memref<9x8x128xf32, #tpu.memory_space<vmem>>, %arg3: memref<1x128xf32, #tpu.memory_space<vmem>>, %arg4: memref<1x256x128xf32, #tpu.memory_space<vmem>>) attributes {dimension_semantics = [#tpu.dimension_semantics<parallel>], iteration_bounds = array<i64: 2>, scalar_prefetch = 0 : i64, scratch_operands = 0 : i64, tpu.core_type = #tpu.core_type<tc>, window_params = [{transform_indices = @transform_0, window_bounds = array<i64: 1, 20, 20, 8>}, {pipeline_mode = #tpu.pipeline_mode<synchronous>, transform_indices = @transform_1, window_bounds = array<i64: 9, 8, 128>}, {pipeline_mode = #tpu.pipeline_mode<synchronous>, transform_indices = @transform_2, window_bounds = array<i64: 1, 128>}, {transform_indices = @transform_3, window_bounds = array<i64: 1, 256, 128>}]} {
    %c0 = arith.constant 0 : index
    %c0_0 = arith.constant 0 : index
    %c0_1 = arith.constant 0 : index
    %c0_2 = arith.constant 0 : index
    %0 = vector.load %arg1[%c0, %c0_0, %c0_1, %c0_2] : memref<1x20x20x8xf32, #tpu.memory_space<vmem>>, vector<1x16x16x8xf32>
    %1 = vector.shape_cast %0 : vector<1x16x16x8xf32> to vector<16x16x8xf32>
    %2 = vector.shape_cast %1 : vector<16x16x8xf32> to vector<256x8xf32>
    %c0_3 = arith.constant 0 : index
    %c0_4 = arith.constant 0 : index
    %c0_5 = arith.constant 0 : index
    %3 = vector.load %arg2[%c0_3, %c0_4, %c0_5] : memref<9x8x128xf32, #tpu.memory_space<vmem>>, vector<1x8x128xf32>
    %4 = vector.shape_cast %3 : vector<1x8x128xf32> to vector<8x128xf32>
    %cst = arith.constant dense<0.000000e+00> : vector<256x128xf32>
    %5 = tpu.matmul %2, %4, %cst {dimension_numbers = #tpu.dot_dimension_numbers<[1], [0], [0], [1], [0, 0, 1, 1], [], []>} : vector<256x8xf32>, vector<8x128xf32>, vector<256x128xf32> -> vector<256x128xf32>
    %c0_6 = arith.constant 0 : index
    %c0_7 = arith.constant 0 : index
    %c0_8 = arith.constant 0 : index
    %6 = vector.load %arg4[%c0_6, %c0_7, %c0_8] : memref<1x256x128xf32, #tpu.memory_space<vmem>>, vector<1x256x128xf32>
    %7 = vector.shape_cast %6 : vector<1x256x128xf32> to vector<256x128xf32>
    %8 = vector.shape_cast %5 : vector<256x128xf32> to vector<1x256x128xf32>
    tpu.vector_store %arg4[%c0_6, %c0_7, %c0_8], %8 {strides = array<i32>} : memref<1x256x128xf32, #tpu.memory_space<vmem>>, vector<1x256x128xf32>,
    %c0_9 = arith.constant 0 : index
    %c0_10 = arith.constant 0 : index
    %c2 = arith.constant 2 : index
    %c0_11 = arith.constant 0 : index
    %9 = vector.load %arg1[%c0_9, %c0_10, %c2, %c0_11] : memref<1x20x20x8xf32, #tpu.memory_space<vmem>>, vector<1x16x16x8xf32>
    %10 = vector.shape_cast %9 : vector<1x16x16x8xf32> to vector<16x16x8xf32>
    %11 = vector.shape_cast %10 : vector<16x16x8xf32> to vector<256x8xf32>
    %c1 = arith.constant 1 : index
    %c0_12 = arith.constant 0 : index
    %c0_13 = arith.constant 0 : index
    %12 = vector.load %arg2[%c1, %c0_12, %c0_13] : memref<9x8x128xf32, #tpu.memory_space<vmem>>, vector<1x8x128xf32>
    %13 = vector.shape_cast %12 : vector<1x8x128xf32> to vector<8x128xf32>
    %cst_14 = arith.constant dense<0.000000e+00> : vector<256x128xf32>
    %14 = tpu.matmul %11, %13, %cst_14 {dimension_numbers = #tpu.dot_dimension_numbers<[1], [0], [0], [1], [0, 0, 1, 1], [], []>} : vector<256x8xf32>, vector<8x128xf32>, vector<256x128xf32> -> vector<256x128xf32>
    %c0_15 = arith.constant 0 : index
    %c0_16 = arith.constant 0 : index
    %c0_17 = arith.constant 0 : index
    %15 = vector.load %arg4[%c0_15, %c0_16, %c0_17] : memref<1x256x128xf32, #tpu.memory_space<vmem>>, vector<1x256x128xf32>
    %16 = vector.shape_cast %15 : vector<1x256x128xf32> to vector<256x128xf32>
    %17 = arith.addf %16, %14 : vector<256x128xf32>
    %c0_18 = arith.constant 0 : index
    %c0_19 = arith.constant 0 : index
    %c0_20 = arith.constant 0 : index
    %18 = vector.load %arg4[%c0_18, %c0_19, %c0_20] : memref<1x256x128xf32, #tpu.memory_space<vmem>>, vector<1x256x128xf32>
    %19 = vector.shape_cast %18 : vector<1x256x128xf32> to vector<256x128xf32>
    %20 = vector.shape_cast %17 : vector<256x128xf32> to vector<1x256x128xf32>
    tpu.vector_store %arg4[%c0_18, %c0_19, %c0_20], %20 {strides = array<i32>} : memref<1x256x128xf32, #tpu.memory_space<vmem>>, vector<1x256x128xf32>,
    %c0_21 = arith.constant 0 : index
    %c0_22 = arith.constant 0 : index
    %c4 = arith.constant 4 : index
    %c0_23 = arith.constant 0 : index
    %21 = vector.load %arg1[%c0_21, %c0_22, %c4, %c0_23] : memref<1x20x20x8xf32, #tpu.memory_space<vmem>>, vector<1x16x16x8xf32>
    %22 = vector.shape_cast %21 : vector<1x16x16x8xf32> to vector<16x16x8xf32>
    %23 = vector.shape_cast %22 : vector<16x16x8xf32> to vector<256x8xf32>
    %c2_24 = arith.constant 2 : index
    %c0_25 = arith.constant 0 : index
    %c0_26 = arith.constant 0 : index
    %24 = vector.load %arg2[%c2_24, %c0_25, %c0_26] : memref<9x8x128xf32, #tpu.memory_space<vmem>>, vector<1x8x128xf32>
    %25 = vector.shape_cast %24 : vector<1x8x128xf32> to vector<8x128xf32>
    %cst_27 = arith.constant dense<0.000000e+00> : vector<256x128xf32>
    %26 = tpu.matmul %23, %25, %cst_27 {dimension_numbers = #tpu.dot_dimension_numbers<[1], [0], [0], [1], [0, 0, 1, 1], [], []>} : vector<256x8xf32>, vector<8x128xf32>, vector<256x128xf32> -> vector<256x128xf32>
    %c0_28 = arith.constant 0 : index
    %c0_29 = arith.constant 0 : index
    %c0_30 = arith.constant 0 : index
    %27 = vector.load %arg4[%c0_28, %c0_29, %c0_30] : memref<1x256x128xf32, #tpu.memory_space<vmem>>, vector<1x256x128xf32>
    %28 = vector.shape_cast %27 : vector<1x256x128xf32> to vector<256x128xf32>
    %29 = arith.addf %28, %26 : vector<256x128xf32>
    %c0_31 = arith.constant 0 : index
    %c0_32 = arith.constant 0 : index
    %c0_33 = arith.constant 0 : index
    %30 = vector.load %arg4[%c0_31, %c0_32, %c0_33] : memref<1x256x128xf32, #tpu.memory_space<vmem>>, vector<1x256x128xf32>
    %31 = vector.shape_cast %30 : vector<1x256x128xf32> to vector<256x128xf32>
    %32 = vector.shape_cast %29 : vector<256x128xf32> to vector<1x256x128xf32>
    tpu.vector_store %arg4[%c0_31, %c0_32, %c0_33], %32 {strides = array<i32>} : memref<1x256x128xf32, #tpu.memory_space<vmem>>, vector<1x256x128xf32>,
    %c0_34 = arith.constant 0 : index
    %c2_35 = arith.constant 2 : index
    %c0_36 = arith.constant 0 : index
    %c0_37 = arith.constant 0 : index
    %33 = vector.load %arg1[%c0_34, %c2_35, %c0_36, %c0_37] : memref<1x20x20x8xf32, #tpu.memory_space<vmem>>, vector<1x16x16x8xf32>
    %34 = vector.shape_cast %33 : vector<1x16x16x8xf32> to vector<16x16x8xf32>
    %35 = vector.shape_cast %34 : vector<16x16x8xf32> to vector<256x8xf32>
    %c3 = arith.constant 3 : index
    %c0_38 = arith.constant 0 : index
    %c0_39 = arith.constant 0 : index
    %36 = vector.load %arg2[%c3, %c0_38, %c0_39] : memref<9x8x128xf32, #tpu.memory_space<vmem>>, vector<1x8x128xf32>
    %37 = vector.shape_cast %36 : vector<1x8x128xf32> to vector<8x128xf32>
    %cst_40 = arith.constant dense<0.000000e+00> : vector<256x128xf32>
    %38 = tpu.matmul %35, %37, %cst_40 {dimension_numbers = #tpu.dot_dimension_numbers<[1], [0], [0], [1], [0, 0, 1, 1], [], []>} : vector<256x8xf32>, vector<8x128xf32>, vector<256x128xf32> -> vector<256x128xf32>
    %c0_41 = arith.constant 0 : index
    %c0_42 = arith.constant 0 : index
    %c0_43 = arith.constant 0 : index
    %39 = vector.load %arg4[%c0_41, %c0_42, %c0_43] : memref<1x256x128xf32, #tpu.memory_space<vmem>>, vector<1x256x128xf32>
    %40 = vector.shape_cast %39 : vector<1x256x128xf32> to vector<256x128xf32>
    %41 = arith.addf %40, %38 : vector<256x128xf32>
    %c0_44 = arith.constant 0 : index
    %c0_45 = arith.constant 0 : index
    %c0_46 = arith.constant 0 : index
    %42 = vector.load %arg4[%c0_44, %c0_45, %c0_46] : memref<1x256x128xf32, #tpu.memory_space<vmem>>, vector<1x256x128xf32>
    %43 = vector.shape_cast %42 : vector<1x256x128xf32> to vector<256x128xf32>
    %44 = vector.shape_cast %41 : vector<256x128xf32> to vector<1x256x128xf32>
    tpu.vector_store %arg4[%c0_44, %c0_45, %c0_46], %44 {strides = array<i32>} : memref<1x256x128xf32, #tpu.memory_space<vmem>>, vector<1x256x128xf32>,
    %c0_47 = arith.constant 0 : index
    %c2_48 = arith.constant 2 : index
    %c2_49 = arith.constant 2 : index
    %c0_50 = arith.constant 0 : index
    %45 = vector.load %arg1[%c0_47, %c2_48, %c2_49, %c0_50] : memref<1x20x20x8xf32, #tpu.memory_space<vmem>>, vector<1x16x16x8xf32>
    %46 = vector.shape_cast %45 : vector<1x16x16x8xf32> to vector<16x16x8xf32>
    %47 = vector.shape_cast %46 : vector<16x16x8xf32> to vector<256x8xf32>
    %c4_51 = arith.constant 4 : index
    %c0_52 = arith.constant 0 : index
    %c0_53 = arith.constant 0 : index
    %48 = vector.load %arg2[%c4_51, %c0_52, %c0_53] : memref<9x8x128xf32, #tpu.memory_space<vmem>>, vector<1x8x128xf32>
    %49 = vector.shape_cast %48 : vector<1x8x128xf32> to vector<8x128xf32>
    %cst_54 = arith.constant dense<0.000000e+00> : vector<256x128xf32>
    %50 = tpu.matmul %47, %49, %cst_54 {dimension_numbers = #tpu.dot_dimension_numbers<[1], [0], [0], [1], [0, 0, 1, 1], [], []>} : vector<256x8xf32>, vector<8x128xf32>, vector<256x128xf32> -> vector<256x128xf32>
    %c0_55 = arith.constant 0 : index
    %c0_56 = arith.constant 0 : index
    %c0_57 = arith.constant 0 : index
    %51 = vector.load %arg4[%c0_55, %c0_56, %c0_57] : memref<1x256x128xf32, #tpu.memory_space<vmem>>, vector<1x256x128xf32>
    %52 = vector.shape_cast %51 : vector<1x256x128xf32> to vector<256x128xf32>
    %53 = arith.addf %52, %50 : vector<256x128xf32>
    %c0_58 = arith.constant 0 : index
    %c0_59 = arith.constant 0 : index
    %c0_60 = arith.constant 0 : index
    %54 = vector.load %arg4[%c0_58, %c0_59, %c0_60] : memref<1x256x128xf32, #tpu.memory_space<vmem>>, vector<1x256x128xf32>
    %55 = vector.shape_cast %54 : vector<1x256x128xf32> to vector<256x128xf32>
    %56 = vector.shape_cast %53 : vector<256x128xf32> to vector<1x256x128xf32>
    tpu.vector_store %arg4[%c0_58, %c0_59, %c0_60], %56 {strides = array<i32>} : memref<1x256x128xf32, #tpu.memory_space<vmem>>, vector<1x256x128xf32>,
    %c0_61 = arith.constant 0 : index
    %c2_62 = arith.constant 2 : index
    %c4_63 = arith.constant 4 : index
    %c0_64 = arith.constant 0 : index
    %57 = vector.load %arg1[%c0_61, %c2_62, %c4_63, %c0_64] : memref<1x20x20x8xf32, #tpu.memory_space<vmem>>, vector<1x16x16x8xf32>
    %58 = vector.shape_cast %57 : vector<1x16x16x8xf32> to vector<16x16x8xf32>
    %59 = vector.shape_cast %58 : vector<16x16x8xf32> to vector<256x8xf32>
    %c5 = arith.constant 5 : index
    %c0_65 = arith.constant 0 : index
    %c0_66 = arith.constant 0 : index
    %60 = vector.load %arg2[%c5, %c0_65, %c0_66] : memref<9x8x128xf32, #tpu.memory_space<vmem>>, vector<1x8x128xf32>
    %61 = vector.shape_cast %60 : vector<1x8x128xf32> to vector<8x128xf32>
    %cst_67 = arith.constant dense<0.000000e+00> : vector<256x128xf32>
    %62 = tpu.matmul %59, %61, %cst_67 {dimension_numbers = #tpu.dot_dimension_numbers<[1], [0], [0], [1], [0, 0, 1, 1], [], []>} : vector<256x8xf32>, vector<8x128xf32>, vector<256x128xf32> -> vector<256x128xf32>
    %c0_68 = arith.constant 0 : index
    %c0_69 = arith.constant 0 : index
    %c0_70 = arith.constant 0 : index
    %63 = vector.load %arg4[%c0_68, %c0_69, %c0_70] : memref<1x256x128xf32, #tpu.memory_space<vmem>>, vector<1x256x128xf32>
    %64 = vector.shape_cast %63 : vector<1x256x128xf32> to vector<256x128xf32>
    %65 = arith.addf %64, %62 : vector<256x128xf32>
    %c0_71 = arith.constant 0 : index
    %c0_72 = arith.constant 0 : index
    %c0_73 = arith.constant 0 : index
    %66 = vector.load %arg4[%c0_71, %c0_72, %c0_73] : memref<1x256x128xf32, #tpu.memory_space<vmem>>, vector<1x256x128xf32>
    %67 = vector.shape_cast %66 : vector<1x256x128xf32> to vector<256x128xf32>
    %68 = vector.shape_cast %65 : vector<256x128xf32> to vector<1x256x128xf32>
    tpu.vector_store %arg4[%c0_71, %c0_72, %c0_73], %68 {strides = array<i32>} : memref<1x256x128xf32, #tpu.memory_space<vmem>>, vector<1x256x128xf32>,
    %c0_74 = arith.constant 0 : index
    %c4_75 = arith.constant 4 : index
    %c0_76 = arith.constant 0 : index
    %c0_77 = arith.constant 0 : index
    %69 = vector.load %arg1[%c0_74, %c4_75, %c0_76, %c0_77] : memref<1x20x20x8xf32, #tpu.memory_space<vmem>>, vector<1x16x16x8xf32>
    %70 = vector.shape_cast %69 : vector<1x16x16x8xf32> to vector<16x16x8xf32>
    %71 = vector.shape_cast %70 : vector<16x16x8xf32> to vector<256x8xf32>
    %c6 = arith.constant 6 : index
    %c0_78 = arith.constant 0 : index
    %c0_79 = arith.constant 0 : index
    %72 = vector.load %arg2[%c6, %c0_78, %c0_79] : memref<9x8x128xf32, #tpu.memory_space<vmem>>, vector<1x8x128xf32>
    %73 = vector.shape_cast %72 : vector<1x8x128xf32> to vector<8x128xf32>
    %cst_80 = arith.constant dense<0.000000e+00> : vector<256x128xf32>
    %74 = tpu.matmul %71, %73, %cst_80 {dimension_numbers = #tpu.dot_dimension_numbers<[1], [0], [0], [1], [0, 0, 1, 1], [], []>} : vector<256x8xf32>, vector<8x128xf32>, vector<256x128xf32> -> vector<256x128xf32>
    %c0_81 = arith.constant 0 : index
    %c0_82 = arith.constant 0 : index
    %c0_83 = arith.constant 0 : index
    %75 = vector.load %arg4[%c0_81, %c0_82, %c0_83] : memref<1x256x128xf32, #tpu.memory_space<vmem>>, vector<1x256x128xf32>
    %76 = vector.shape_cast %75 : vector<1x256x128xf32> to vector<256x128xf32>
    %77 = arith.addf %76, %74 : vector<256x128xf32>
    %c0_84 = arith.constant 0 : index
    %c0_85 = arith.constant 0 : index
    %c0_86 = arith.constant 0 : index
    %78 = vector.load %arg4[%c0_84, %c0_85, %c0_86] : memref<1x256x128xf32, #tpu.memory_space<vmem>>, vector<1x256x128xf32>
    %79 = vector.shape_cast %78 : vector<1x256x128xf32> to vector<256x128xf32>
    %80 = vector.shape_cast %77 : vector<256x128xf32> to vector<1x256x128xf32>
    tpu.vector_store %arg4[%c0_84, %c0_85, %c0_86], %80 {strides = array<i32>} : memref<1x256x128xf32, #tpu.memory_space<vmem>>, vector<1x256x128xf32>,
    %c0_87 = arith.constant 0 : index
    %c4_88 = arith.constant 4 : index
    %c2_89 = arith.constant 2 : index
    %c0_90 = arith.constant 0 : index
    %81 = vector.load %arg1[%c0_87, %c4_88, %c2_89, %c0_90] : memref<1x20x20x8xf32, #tpu.memory_space<vmem>>, vector<1x16x16x8xf32>
    %82 = vector.shape_cast %81 : vector<1x16x16x8xf32> to vector<16x16x8xf32>
    %83 = vector.shape_cast %82 : vector<16x16x8xf32> to vector<256x8xf32>
    %c7 = arith.constant 7 : index
    %c0_91 = arith.constant 0 : index
    %c0_92 = arith.constant 0 : index
    %84 = vector.load %arg2[%c7, %c0_91, %c0_92] : memref<9x8x128xf32, #tpu.memory_space<vmem>>, vector<1x8x128xf32>
    %85 = vector.shape_cast %84 : vector<1x8x128xf32> to vector<8x128xf32>
    %cst_93 = arith.constant dense<0.000000e+00> : vector<256x128xf32>
    %86 = tpu.matmul %83, %85, %cst_93 {dimension_numbers = #tpu.dot_dimension_numbers<[1], [0], [0], [1], [0, 0, 1, 1], [], []>} : vector<256x8xf32>, vector<8x128xf32>, vector<256x128xf32> -> vector<256x128xf32>
    %c0_94 = arith.constant 0 : index
    %c0_95 = arith.constant 0 : index
    %c0_96 = arith.constant 0 : index
    %87 = vector.load %arg4[%c0_94, %c0_95, %c0_96] : memref<1x256x128xf32, #tpu.memory_space<vmem>>, vector<1x256x128xf32>
    %88 = vector.shape_cast %87 : vector<1x256x128xf32> to vector<256x128xf32>
    %89 = arith.addf %88, %86 : vector<256x128xf32>
    %c0_97 = arith.constant 0 : index
    %c0_98 = arith.constant 0 : index
    %c0_99 = arith.constant 0 : index
    %90 = vector.load %arg4[%c0_97, %c0_98, %c0_99] : memref<1x256x128xf32, #tpu.memory_space<vmem>>, vector<1x256x128xf32>
    %91 = vector.shape_cast %90 : vector<1x256x128xf32> to vector<256x128xf32>
    %92 = vector.shape_cast %89 : vector<256x128xf32> to vector<1x256x128xf32>
    tpu.vector_store %arg4[%c0_97, %c0_98, %c0_99], %92 {strides = array<i32>} : memref<1x256x128xf32, #tpu.memory_space<vmem>>, vector<1x256x128xf32>,
    %c0_100 = arith.constant 0 : index
    %c4_101 = arith.constant 4 : index
    %c4_102 = arith.constant 4 : index
    %c0_103 = arith.constant 0 : index
    %93 = vector.load %arg1[%c0_100, %c4_101, %c4_102, %c0_103] : memref<1x20x20x8xf32, #tpu.memory_space<vmem>>, vector<1x16x16x8xf32>
    %94 = vector.shape_cast %93 : vector<1x16x16x8xf32> to vector<16x16x8xf32>
    %95 = vector.shape_cast %94 : vector<16x16x8xf32> to vector<256x8xf32>
    %c8 = arith.constant 8 : index
    %c0_104 = arith.constant 0 : index
    %c0_105 = arith.constant 0 : index
    %96 = vector.load %arg2[%c8, %c0_104, %c0_105] : memref<9x8x128xf32, #tpu.memory_space<vmem>>, vector<1x8x128xf32>
    %97 = vector.shape_cast %96 : vector<1x8x128xf32> to vector<8x128xf32>
    %cst_106 = arith.constant dense<0.000000e+00> : vector<256x128xf32>
    %98 = tpu.matmul %95, %97, %cst_106 {dimension_numbers = #tpu.dot_dimension_numbers<[1], [0], [0], [1], [0, 0, 1, 1], [], []>} : vector<256x8xf32>, vector<8x128xf32>, vector<256x128xf32> -> vector<256x128xf32>
    %c0_107 = arith.constant 0 : index
    %c0_108 = arith.constant 0 : index
    %c0_109 = arith.constant 0 : index
    %99 = vector.load %arg4[%c0_107, %c0_108, %c0_109] : memref<1x256x128xf32, #tpu.memory_space<vmem>>, vector<1x256x128xf32>
    %100 = vector.shape_cast %99 : vector<1x256x128xf32> to vector<256x128xf32>
    %101 = arith.addf %100, %98 : vector<256x128xf32>
    %c0_110 = arith.constant 0 : index
    %c0_111 = arith.constant 0 : index
    %c0_112 = arith.constant 0 : index
    %102 = vector.load %arg4[%c0_110, %c0_111, %c0_112] : memref<1x256x128xf32, #tpu.memory_space<vmem>>, vector<1x256x128xf32>
    %103 = vector.shape_cast %102 : vector<1x256x128xf32> to vector<256x128xf32>
    %104 = vector.shape_cast %101 : vector<256x128xf32> to vector<1x256x128xf32>
    tpu.vector_store %arg4[%c0_110, %c0_111, %c0_112], %104 {strides = array<i32>} : memref<1x256x128xf32, #tpu.memory_space<vmem>>, vector<1x256x128xf32>,
    %c0_113 = arith.constant 0 : index
    %c0_114 = arith.constant 0 : index
    %c0_115 = arith.constant 0 : index
    %105 = vector.load %arg4[%c0_113, %c0_114, %c0_115] : memref<1x256x128xf32, #tpu.memory_space<vmem>>, vector<1x256x128xf32>
    %106 = vector.shape_cast %105 : vector<1x256x128xf32> to vector<256x128xf32>
    %c0_116 = arith.constant 0 : index
    %c0_117 = arith.constant 0 : index
    %107 = vector.load %arg3[%c0_116, %c0_117] : memref<1x128xf32, #tpu.memory_space<vmem>>, vector<1x128xf32>
    %108 = vector.shape_cast %107 : vector<1x128xf32> to vector<128xf32>
    %109 = vector.shape_cast %108 : vector<128xf32> to vector<1x128xf32>
    %110 = vector.broadcast %109 : vector<1x128xf32> to vector<256x128xf32>
    %111 = arith.addf %106, %110 : vector<256x128xf32>
    %cst_118 = arith.constant 0.000000e+00 : f32
    %112 = vector.broadcast %cst_118 : f32 to vector<256x128xf32>
    %113 = arith.maximumf %111, %112 : vector<256x128xf32>
    %c0_119 = arith.constant 0 : index
    %c0_120 = arith.constant 0 : index
    %c0_121 = arith.constant 0 : index
    %114 = vector.load %arg4[%c0_119, %c0_120, %c0_121] : memref<1x256x128xf32, #tpu.memory_space<vmem>>, vector<1x256x128xf32>
    %115 = vector.shape_cast %114 : vector<1x256x128xf32> to vector<256x128xf32>
    %116 = vector.shape_cast %113 : vector<256x128xf32> to vector<1x256x128xf32>
    tpu.vector_store %arg4[%c0_119, %c0_120, %c0_121], %116 {strides = array<i32>} : memref<1x256x128xf32, #tpu.memory_space<vmem>>, vector<1x256x128xf32>,
    return
  }
  func.func @transform_0(%arg0: i32) -> (i32, i32, i32, i32) {
    %c0_i32 = arith.constant 0 : i32
    %c0_i32_0 = arith.constant 0 : i32
    %c0_i32_1 = arith.constant 0 : i32
    %c0_i32_2 = arith.constant 0 : i32
    return %arg0, %c0_i32, %c0_i32_0, %c0_i32_1 : i32, i32, i32, i32
  }
  func.func @transform_1(%arg0: i32) -> (i32, i32, i32) {
    %c0_i32 = arith.constant 0 : i32
    %c0_i32_0 = arith.constant 0 : i32
    %c0_i32_1 = arith.constant 0 : i32
    %c0_i32_2 = arith.constant 0 : i32
    return %c0_i32, %c0_i32_0, %c0_i32_1 : i32, i32, i32
  }
  func.func @transform_2(%arg0: i32) -> (i32, i32) {
    %c0_i32 = arith.constant 0 : i32
    %c0_i32_0 = arith.constant 0 : i32
    %c0_i32_1 = arith.constant 0 : i32
    return %c0_i32, %c0_i32_0 : i32, i32
  }
  func.func @transform_3(%arg0: i32) -> (i32, i32, i32) {
    %c0_i32 = arith.constant 0 : i32
    %c0_i32_0 = arith.constant 0 : i32
    %c0_i32_1 = arith.constant 0 : i32
    return %arg0, %c0_i32, %c0_i32_0 : i32, i32, i32
  }
}

</mosaic_0001>

<bundles_post_ra>
// kernel: tpu_custom_call.1
= control target key start
LH: loop header
LB: loop body
LE: loop exit
PB: predicated region body
PF: predicated region fallthrough
CT: control target
= control target key end

     0   :  { %8 = vsyncpa [#allocation3], 0  ;;  %s7186_s0 = inlined_call_operand.vmem [shape: f32[2,20,20,8], index: 0, kind: input, shape index: {}]   ;;  %s7187_s1 = inlined_call_operand.vmem [shape: f32[9,8,128], index: 1, kind: input, shape index: {}]   ;;  %s7188_s2 = inlined_call_operand.vmem [shape: f32[1,128], index: 2, kind: input, shape index: {}]   ;;  %s7189_s3 = inlined_call_operand.hbm [shape: f32[2,256,128], index: 3, kind: output, shape index: {}]  }
   0x1   :  { %10 = vsyncpa [#allocation3 + $0x1], 0  ;;  %s6076_s12 = smov 0   ;;  %s6078_s13 = smov 0  }
   0x2   :  { %s6080_s14 = smov 0   ;;  %s6082_s15 = smov 0  }
   0x3 LB: > { %s6097_s16 = sadd.s32 4294967295, %s6051_s15   ;;  %s4377_s17 = sadd.s32 4294967294, %s6051_s15   ;;  %s6051_s15 = sphi %s6082_s15, %s7283_s15   ;;  %s6047_s14 = sphi %s6080_s14, %s7282_s14   ;;  %s6043_s13 = sphi %s6078_s13, %s7281_s13   ;;  %s6039_s12 = sphi %s6076_s12, %s7280_s12  }
   0x4   : > { %s6101_s18 = sadd.s32 1, %s6051_s15   ;;  %s91_s19 = sadd.s32 1, %s6047_s14 }
   0x5   : > { %s88_s20 = ssub.s32 %s6051_s15, %s6101_s18  ;;  %p101_p0 = scmp.ne.s32.totalorder %s6047_s14, %s6043_s13 }
   0x6   : > { %p89_p1 = scmp.eq.s32.totalorder %s88_s20, 0  ;;  %p102_p2 = scmp.eq.s32.totalorder %s6097_s16, 1 }
   0x7   : > { %p107_p3 = scmp.ne.s32.totalorder %s6043_s13, %s6039_s12  ;;  %p108_p4 = scmp.eq.s32.totalorder %s4377_s17, 1 }
   0x8   : > { %s6112_s21 = scalar_select %p89_p1, %s6047_s14, %s91_s19  }
   0x9   : > { %p6114_p5 = por %p102_p2, %p101_p0  ;;  %p6118_p6 = por %p108_p4, %p107_p3 }
   0xa   : > { %p4380_p7 = scmp.ge.s32.totalorder %s6051_s15, 1  ;;  %p140_p8 = scmp.lt.s32.totalorder %s6051_s15, 3 }
   0xc   : > { %p141_p9 = pnand %p4380_p7, %p140_p8 }
   0xe   : > { %144 = sbr.rel (%p141_p9) target bundleno = 548 (0x224), region = 32 }
  0x15   : > { %v201_v0 = vld [vmem:[%s7187_s1] sm:$0xff]  ;;  %p164_p10 = scmp.lt.s32.totalorder %s6097_s16, 1  ;;  %v4415_v2 = vld [vmem:[%s7187_s1 + $0x8] sm:$0xff]  ;;  %vm202_vm0 = vcmask 64512   ;;  %v6168_v10 = vld [vmem:[%s7187_s1 + $0x30] sm:$0xff]  ;;  %s161_s29 = sand.u32 1, %s6043_s13  }
  0x16   : > { %v6130_v1 = vld [vmem:[%s7187_s1 + $0x20] sm:$0xff]  ;;  %5175 = vmatprep.subr.mxu1 %v201_v0  ;;  %v4643_v3 = vld [vmem:[%s7187_s1 + $0x28] sm:$0xff]  ;;  %v6173_v11 = vld [vmem:[%s7187_s1 + $0x10] sm:$0xff]  ;;  %s4877_s7 = sshll.u32 %s6097_s16, 12  ;;  %s6053_s19 = smov [#allocation2]  }
  0x17   : > { %5375 = vmatprep.subr.mxu0 %v6130_v1  ;;  %5176 = vmatpush3.msra.mxu1 %v201_v0  ;;  %s165_s5 = scalar_select %p164_p10, %s6097_s16, 1  ;;  %v6336_v44 = vld [vmem:[%s7187_s1 + $0x38] sm:$0xff] }
  0x18   : > { %5376 = vmatpush3.msra.mxu0 %v6130_v1  ;;  %5225 = vmatprep.subr.mxu1 %v4415_v2  ;;  %s7137_s11 = scalar_lea.hbm %s7189_s3, %s4877_s7  ;;  %s7145_s16 = scalar_lea.sflag [#allocation3], %s161_s29 }
  0x19   : > { %5425 = vmatprep.subr.mxu0 %v4643_v3  ;;  %s5947_s6 = smul.u32 480, %s165_s5  ;;  %s4381_s5 = sshll.u32 %s161_s29, 8 }
  0x1a   : > { %s5993_s20 = sshll.u32 %s6053_s19, 4  ;;  %s5994_s20 = int_to_ptr.vmem [resolvable:$false] %s5993_s20 }
  0x1b   : > { %s6145_s9 = scalar_lea.vmem %s7186_s0, %s5947_s6  ;;  %s7066_s6 = scalar_lea.vmem [#allocation2], %s4381_s5 }
  0x1c   : > { %v169_v4 = vld [vmem:[%s6145_s9] sm:$0xff]  ;;  %v6149_v5 = vld [vmem:[%s6145_s9 + $0x32] sm:$0xff]  ;;  %v170_v6 = vld [vmem:[%s6145_s9 + $0x8] sm:$0xff]  ;;  %s4315_s8 = sshll.u32 %s7066_s6, 4  ;;  %s5995_s24 = scalar_lea.vmem %s5994_s20, 8192  ;;  %s7139_s8 = int_to_ptr.vmem [resolvable:$true] %s4315_s8 }
  0x1d   : > { %5177 = vmatprep.mubr.msk.f32.mxu1 %vm202_vm0, %v169_v4  ;;  %5377 = vmatprep.mubr.msk.f32.mxu0 %vm202_vm0, %v6149_v5  ;;  %v6156_v7 = vld [vmem:[%s6145_s9 + $0x3a] sm:$0xff]  ;;  %v6160_v9 = vld [vmem:[%s6145_s9 + $0x4a] sm:$0xff]  ;;  %v6178_v13 = vld [vmem:[%s6145_s9 + $0x52] sm:$0xff]  ;;  %s5989_s17 = scalar_lea.vmem %s7139_s8, 4096  ;;  %p5996_p0 = scmp.lt.s32.totalorder %s7139_s8, %s5994_s20 }
  0x1e   : > { %v171_v8 = vld [vmem:[%s6145_s9 + $0x18] sm:$0xff]  ;;  %5178 = vmatmul.mubr.msk.f32.vlgmr.msra.gmra.mrb[0].mxu1 %vm202_vm0, %v170_v6  ;;  %5378 = vmatmul.mubr.msk.f32.vlgmr.msra.gmra.mrb[0].mxu0 %vm202_vm0, %v6156_v7  ;;  %v172_v12 = vld [vmem:[%s6145_s9 + $0x20] sm:$0xff]  ;;  %v6183_v14 = vld [vmem:[%s6145_s9 + $0x30] sm:$0xff]  ;;  %p5990_p11 = scmp.ne.s32.totalorder %s7139_s8, %s5989_s17  ;;  %p5997_p1 = scmp.lt.s32.totalorder %s5995_s24, %s5989_s17 }
  0x1f   : > { %5226 = vmatpush3.msra.mxu1 %v4415_v2  ;;  %5180 = vmatprep.mubr.msk.f32.mxu1 %vm202_vm0, %v171_v8  ;;  %7226 = vst [vmem:[#allocation5_spill] sm:$0xff] %v6183_v14  ;;  %v6186_v15 = vld [vmem:[%s6145_s9 + $0x62] sm:$0xff]  ;;  %v6198_v16 = vld [vmem:[%s6145_s9 + $0x38] sm:$0xff]  ;;  %v6201_v17 = vld [vmem:[%s6145_s9 + $0x6a] sm:$0xff] }
  0x20   : > { %5380 = vmatprep.mubr.msk.f32.mxu0 %vm202_vm0, %v6160_v9  ;;  %5426 = vmatpush3.msra.mxu0 %v4643_v3  ;;  %7227 = vst [vmem:[#allocation6_spill] sm:$0xff] %v6198_v16  ;;  %v6204_v18 = vld [vmem:[%s6145_s9 + $0x48] sm:$0xff]  ;;  %v6207_v19 = vld [vmem:[%s6145_s9 + $0x7a] sm:$0xff]  ;;  %v6218_v20 = vld [vmem:[%s6145_s9 + $0x50] sm:$0xff]  ;;  %p5991_p12 = pnand %p5990_p11, %p6114_p5  ;;  %p5998_p2 = por %p5997_p1, %p5996_p0 }
  0x21   : > { %5475 = vmatprep.subr.mxu0 %v6168_v10  ;;  %5275 = vmatprep.subr.mxu1 %v6173_v11  ;;  %7228 = vst [vmem:[#allocation7_spill] sm:$0xff] %v6204_v18  ;;  %7229 = vst [vmem:[#allocation8_spill] sm:$0xff] %v6218_v20  ;;  %v6221_v21 = vld [vmem:[%s6145_s9 + $0x82] sm:$0xff]  ;;  %v6227_v23 = vld [vmem:[%s6145_s9 + $0x92] sm:$0xff] }
  0x22   : > { %5181 = vmatmul.mubr.msk.f32.gmra.mrb[2].mxu1 %vm202_vm0, %v172_v12  ;;  %5381 = vmatmul.mubr.msk.f32.gmra.mrb[2].mxu0 %vm202_vm0, %v6178_v13  ;;  %v6224_v22 = vld [vmem:[%s6145_s9 + $0x60] sm:$0xff]  ;;  %v6238_v24 = vld [vmem:[%s6145_s9 + $0x68] sm:$0xff]  ;;  %v6244_v26 = vld [vmem:[%s6145_s9 + $0x78] sm:$0xff]  ;;  %p5992_p13 = pneg %p5991_p12 }
  0x23   : > { %5183 = vmatprep.mubr.msk.f32.mxu1 %vm202_vm0, %v6183_v14  ;;  %5383 = vmatprep.mubr.msk.f32.mxu0 %vm202_vm0, %v6186_v15  ;;  %v6241_v25 = vld [vmem:[%s6145_s9 + $0x9a] sm:$0xff]  ;;  %v6247_v27 = vld [vmem:[%s6145_s9 + $0xaa] sm:$0xff]  ;;  %v6261_v29 = vld [vmem:[%s6145_s9 + $0xb2] sm:$0xff] }
  0x24   : > { %v6258_v28 = vld [vmem:[%s6145_s9 + $0x80] sm:$0xff]  ;;  %v6264_v30 = vld [vmem:[%s6145_s9 + $0x90] sm:$0xff]  ;;  %v6278_v32 = vld [vmem:[%s6145_s9 + $0x98] sm:$0xff]  ;;  %p5999_p3 = pnand %p5998_p2, %p5992_p13 }
  0x25   : > { %7230 = vst [vmem:[#allocation9_spill] sm:$0xff] %v6258_v28  ;;  %7231 = vst [vmem:[#allocation10_spill] sm:$0xff] %v6264_v30  ;;  %v6267_v31 = vld [vmem:[%s6145_s9 + $0xc2] sm:$0xff]  ;;  %v6281_v33 = vld [vmem:[%s6145_s9 + $0xca] sm:$0xff] }
  0x26   : > { %5184 = vmatmul.mubr.msk.f32.gmra.mrb[4].mxu1 %vm202_vm0, %v6198_v16  ;;  %5384 = vmatmul.mubr.msk.f32.gmra.mrb[4].mxu0 %vm202_vm0, %v6201_v17  ;;  %7232 = vst [vmem:[#allocation11_spill] sm:$0xff] %v6278_v32  ;;  %v6284_v34 = vld [vmem:[%s6145_s9 + $0xa8] sm:$0xff]  ;;  %v6287_v35 = vld [vmem:[%s6145_s9 + $0xda] sm:$0xff]  ;;  %v6298_v36 = vld [vmem:[%s6145_s9 + $0xb0] sm:$0xff] }
  0x27   : > { %5186 = vmatprep.mubr.msk.f32.mxu1 %vm202_vm0, %v6204_v18  ;;  %5386 = vmatprep.mubr.msk.f32.mxu0 %vm202_vm0, %v6207_v19  ;;  %7233 = vst [vmem:[#allocation12_spill] sm:$0xff] %v6284_v34  ;;  %7234 = vst [vmem:[#allocation13_spill] sm:$0xff] %v6298_v36  ;;  %v6301_v37 = vld [vmem:[%s6145_s9 + $0xe2] sm:$0xff]  ;;  %v6307_v39 = vld [vmem:[%s6145_s9 + $0x34] sm:$0xff] }
  0x28   : > { %v6304_v38 = vld [vmem:[%s6145_s9 + $0xc0] sm:$0xff]  ;;  %v6318_v40 = vld [vmem:[%s6145_s9 + $0xc8] sm:$0xff]  ;;  %v6324_v42 = vld [vmem:[%s6145_s9 + $0xd8] sm:$0xff] }
  0x29   : > { %7235 = vst [vmem:[#allocation14_spill] sm:$0xff] %v6304_v38  ;;  %7236 = vst [vmem:[#allocation15_spill] sm:$0xff] %v6318_v40  ;;  %v6321_v41 = vld [vmem:[%s6145_s9 + $0x3c] sm:$0xff]  ;;  %v6327_v43 = vld [vmem:[%s6145_s9 + $0x4c] sm:$0xff] }
  0x2a   : > { %5187 = vmatmul.mubr.msk.f32.gmra.mrb[6].mxu1 %vm202_vm0, %v6218_v20  ;;  %5387 = vmatmul.mubr.msk.f32.gmra.mrb[6].mxu0 %vm202_vm0, %v6221_v21  ;;  %7237 = vst [vmem:[#allocation16_spill] sm:$0xff] %v6324_v42  ;;  %v6343_v45 = vld [vmem:[%s6145_s9 + $0xe0] sm:$0xff]  ;;  %v6346_v46 = vld [vmem:[%s6145_s9 + $0x54] sm:$0xff]  ;;  %v6368_v50 = vld [vmem:[%s6145_s9 + $0x6c] sm:$0xff] }
  0x2b   : > { %5189 = vmatprep.mubr.msk.f32.mxu1 %vm202_vm0, %v6224_v22  ;;  %5389 = vmatprep.mubr.msk.f32.mxu0 %vm202_vm0, %v6227_v23  ;;  %7238 = vst [vmem:[#allocation17_spill] sm:$0xff] %v6343_v45  ;;  %v6349_v47 = vld [vmem:[%s6145_s9 + $0xf0] sm:$0xff]  ;;  %v6352_v48 = vld [vmem:[%s6145_s9 + $0x64] sm:$0xff]  ;;  %v6365_v49 = vld [vmem:[%s6145_s9 + $0xf8] sm:$0xff] }
  0x2c   : > { %7239 = vst [vmem:[#allocation18_spill] sm:$0xff] %v6349_v47  ;;  %7240 = vst [vmem:[#allocation19_spill] sm:$0xff] %v6365_v49  ;;  %v6371_v51 = vld [vmem:[%s6145_s9 + $0x108] sm:$0xff]  ;;  %v6374_v52 = vld [vmem:[%s6145_s9 + $0x7c] sm:$0xff] }
  0x2d   : > { %7241 = vst [vmem:[#allocation20_spill] sm:$0xff] %v6371_v51  ;;  %v6385_v53 = vld [vmem:[%s6145_s9 + $0x110] sm:$0xff]  ;;  %v6388_v54 = vld [vmem:[%s6145_s9 + $0x84] sm:$0xff]  ;;  %v6408_v58 = vld [vmem:[%s6145_s9 + $0x9c] sm:$0xff] }
  0x2e   : > { %5190 = vmatmul.mubr.msk.f32.gmra.mrb[8].mxu1 %vm202_vm0, %v6238_v24  ;;  %5390 = vmatmul.mubr.msk.f32.gmra.mrb[8].mxu0 %vm202_vm0, %v6241_v25  ;;  %v6391_v55 = vld [vmem:[%s6145_s9 + $0x120] sm:$0xff]  ;;  %v6394_v56 = vld [vmem:[%s6145_s9 + $0x94] sm:$0xff]  ;;  %v6405_v57 = vld [vmem:[%s6145_s9 + $0x128] sm:$0xff] }
  0x2f   : > { %5192 = vmatprep.mubr.msk.f32.mxu1 %vm202_vm0, %v6244_v26  ;;  %5392 = vmatprep.mubr.msk.f32.mxu0 %vm202_vm0, %v6247_v27  ;;  %v6411_v59 = vld [vmem:[%s6145_s9 + $0x138] sm:$0xff]  ;;  %v6414_v60 = vld [vmem:[%s6145_s9 + $0xac] sm:$0xff]  ;;  %v6425_v61 = vld [vmem:[%s6145_s9 + $0x140] sm:$0xff] }
  0x30   : > { %v6428_v62 = vld [vmem:[%s6145_s9 + $0xb4] sm:$0xff]  ;;  %v6434_v0 = vld [vmem:[%s6145_s9 + $0xc4] sm:$0xff]  ;;  %v6448_v3 = vld [vmem:[%s6145_s9 + $0xcc] sm:$0xff] }
  0x31   : > { %v6431_v63 = vld [vmem:[%s6145_s9 + $0x150] sm:$0xff]  ;;  %v6445_v2 = vld [vmem:[%s6145_s9 + $0x158] sm:$0xff]  ;;  %7242 = vst [vmem:[#allocation21_spill] sm:$0xff] %v6448_v3  ;;  %v6451_v4 = vld [vmem:[%s6145_s9 + $0x168] sm:$0xff] }
  0x32   : > { %5193 = vmatmul.mubr.msk.f32.gmra.mrb[10].mxu1 %vm202_vm0, %v6258_v28  ;;  %5393 = vmatmul.mubr.msk.f32.gmra.mrb[10].mxu0 %vm202_vm0, %v6261_v29  ;;  %v6454_v6 = vld [vmem:[%s6145_s9 + $0xdc] sm:$0xff]  ;;  %v6465_v8 = vld [vmem:[%s6145_s9 + $0x170] sm:$0xff] }
  0x33   : > { %5195 = vmatprep.mubr.msk.f32.mxu1 %vm202_vm0, %v6264_v30  ;;  %5395 = vmatprep.mubr.msk.f32.mxu0 %vm202_vm0, %v6267_v31  ;;  %7243 = vst [vmem:[#allocation22_spill] sm:$0xff] %v6454_v6  ;;  %v556_v12 = vld [vmem:[%s6145_s9 + $0x2] sm:$0xff]  ;;  %v6472_v20 = vld [vmem:[%s6145_s9 + $0xf4] sm:$0xff]  ;;  %v557_v18 = vld [vmem:[%s6145_s9 + $0xa] sm:$0xff] }
  0x34   : > { %7245 = vst [vmem:[#allocation24_spill] sm:$0xff] %v6472_v20  ;;  %v6483_v16 = vld [vmem:[%s6145_s9 + $0xfc] sm:$0xff] }
  0x35   : > { %v558_v14 = vld [vmem:[%s6145_s9 + $0x1a] sm:$0xff] }
  0x36   : > { %5196 = vmatmul.mubr.msk.f32.gmra.mrb[12].mxu1 %vm202_vm0, %v6278_v32  ;;  %5396 = vmatmul.mubr.msk.f32.gmra.mrb[12].mxu0 %vm202_vm0, %v6281_v33 }
  0x37   : > { %5198 = vmatprep.mubr.msk.f32.mxu1 %vm202_vm0, %v6284_v34  ;;  %5398 = vmatprep.mubr.msk.f32.mxu0 %vm202_vm0, %v6287_v35 }
  0x3a   : > { %5199 = vmatmul.mubr.msk.f32.gmra.mrb[14].mxu1 %vm202_vm0, %v6298_v36  ;;  %5399 = vmatmul.mubr.msk.f32.gmra.mrb[14].mxu0 %vm202_vm0, %v6301_v37 }
  0x3b   : > { %5201 = vmatprep.mubr.msk.f32.mxu1 %vm202_vm0, %v6304_v38  ;;  %5427 = vmatprep.mubr.msk.f32.mxu0 %vm202_vm0, %v6307_v39 }
  0x3e   : > { %5202 = vmatmul.mubr.msk.f32.gmra.mrb[16].mxu1 %vm202_vm0, %v6318_v40  ;;  %5428 = vmatmul.mubr.msk.f32.vlgmr.msra.gmra.mrb[0].mxu0 %vm202_vm0, %v6321_v41 }
  0x3f   : > { %5204 = vmatprep.mubr.msk.f32.mxu1 %vm202_vm0, %v6324_v42  ;;  %5430 = vmatprep.mubr.msk.f32.mxu0 %vm202_vm0, %v6327_v43 }
  0x40   : > { %5476 = vmatpush3.msra.mxu0 %v6168_v10  ;;  %v6468_v10 = vld [vmem:[%s6145_s9 + $0xe4] sm:$0xff] }
  0x41   : > { %5525 = vmatprep.subr.mxu0 %v6336_v44  ;;  %7244 = vst [vmem:[#allocation23_spill] sm:$0xff] %v6468_v10 }
  0x42   : > { %5205 = vmatmul.mubr.msk.f32.gmra.mrb[18].mxu1 %vm202_vm0, %v6343_v45  ;;  %5431 = vmatmul.mubr.msk.f32.gmra.mrb[2].mxu0 %vm202_vm0, %v6346_v46 }
  0x43   : > { %5207 = vmatprep.mubr.msk.f32.mxu1 %vm202_vm0, %v6349_v47  ;;  %5433 = vmatprep.mubr.msk.f32.mxu0 %vm202_vm0, %v6352_v48 }
  0x46   : > { %5208 = vmatmul.mubr.msk.f32.gmra.mrb[20].mxu1 %vm202_vm0, %v6365_v49  ;;  %5434 = vmatmul.mubr.msk.f32.gmra.mrb[4].mxu0 %vm202_vm0, %v6368_v50 }
  0x47   : > { %5210 = vmatprep.mubr.msk.f32.mxu1 %vm202_vm0, %v6371_v51  ;;  %5436 = vmatprep.mubr.msk.f32.mxu0 %vm202_vm0, %v6374_v52 }
  0x4a   : > { %5211 = vmatmul.mubr.msk.f32.gmra.mrb[22].mxu1 %vm202_vm0, %v6385_v53  ;;  %5437 = vmatmul.mubr.msk.f32.gmra.mrb[6].mxu0 %vm202_vm0, %v6388_v54 }
  0x4b   : > { %5213 = vmatprep.mubr.msk.f32.mxu1 %vm202_vm0, %v6391_v55  ;;  %5439 = vmatprep.mubr.msk.f32.mxu0 %vm202_vm0, %v6394_v56 }
  0x4e   : > { %5214 = vmatmul.mubr.msk.f32.gmra.mrb[24].mxu1 %vm202_vm0, %v6405_v57  ;;  %5440 = vmatmul.mubr.msk.f32.gmra.mrb[8].mxu0 %vm202_vm0, %v6408_v58 }
  0x4f   : > { %5216 = vmatprep.mubr.msk.f32.mxu1 %vm202_vm0, %v6411_v59  ;;  %5442 = vmatprep.mubr.msk.f32.mxu0 %vm202_vm0, %v6414_v60 }
  0x52   : > { %5217 = vmatmul.mubr.msk.f32.gmra.mrb[26].mxu1 %vm202_vm0, %v6425_v61  ;;  %5443 = vmatmul.mubr.msk.f32.gmra.mrb[10].mxu0 %vm202_vm0, %v6428_v62 }
  0x53   : > { %5219 = vmatprep.mubr.msk.f32.mxu1 %vm202_vm0, %v6431_v63  ;;  %5445 = vmatprep.mubr.msk.f32.mxu0 %vm202_vm0, %v6434_v0 }
  0x56   : > { %5220 = vmatmul.mubr.msk.f32.gmra.mrb[28].mxu1 %vm202_vm0, %v6445_v2  ;;  %5446 = vmatmul.mubr.msk.f32.gmra.mrb[12].mxu0 %vm202_vm0, %v6448_v3  ;;  %v6492_v3 = vld [vmem:[%s7187_s1 + $0x18] sm:$0xff] }
  0x57   : > { %5222 = vmatprep.mubr.msk.f32.mxu1 %vm202_vm0, %v6451_v4  ;;  %5448 = vmatprep.mubr.msk.f32.mxu0 %vm202_vm0, %v6454_v6  ;;  %v6487_v6 = vld [vmem:[%s6145_s9 + $0x10c] sm:$0xff] }
  0x5a   : > { %5223 = vmatmul.mubr.msk.f32.gmra.mrb[30].mxu1 %vm202_vm0, %v6465_v8  ;;  %5449 = vmatmul.mubr.msk.f32.gmra.mrb[14].mxu0 %vm202_vm0, %v6468_v10  ;;  %v6506_v10 = vld [vmem:[%s6145_s9 + $0x124] sm:$0xff] }
  0x5b   : > { %5227 = vmatprep.mubr.msk.f32.mxu1 %vm202_vm0, %v556_v12  ;;  %5451 = vmatprep.mubr.msk.f32.mxu0 %vm202_vm0, %v6472_v20  ;;  %v559_v12 = vld [vmem:[%s6145_s9 + $0x22] sm:$0xff]  ;;  %v6501_v20 = vld [vmem:[%s6145_s9 + $0x114] sm:$0xff] }
  0x5e   : > { %5228 = vmatmul.mubr.msk.f32.vlgmr.msra.gmra.mrb[0].mxu1 %vm202_vm0, %v557_v18  ;;  %5452 = vmatmul.mubr.msk.f32.gmra.mrb[16].mxu0 %vm202_vm0, %v6483_v16  ;;  %v6534_v18 = vld [vmem:[%s6145_s9 + $0x154] sm:$0xff] }
  0x5f   : > { %5276 = vmatpush3.msra.mxu1 %v6173_v11  ;;  %5230 = vmatprep.mubr.msk.f32.mxu1 %vm202_vm0, %v558_v14  ;;  %v6517_v11 = vld [vmem:[%s6145_s9 + $0x12c] sm:$0xff]  ;;  %v6520_v14 = vld [vmem:[%s6145_s9 + $0x13c] sm:$0xff] }
  0x60   : > { %5454 = vmatprep.mubr.msk.f32.mxu0 %vm202_vm0, %v6487_v6  ;;  %5325 = vmatprep.subr.mxu1 %v6492_v3 }
  0x62   : > { %5231 = vmatmul.mubr.msk.f32.gmra.mrb[2].mxu1 %vm202_vm0, %v559_v12  ;;  %5455 = vmatmul.mubr.msk.f32.gmra.mrb[18].mxu0 %vm202_vm0, %v6501_v20  ;;  %v6562_v12 = vld [vmem:[%s6145_s9 + $0x184] sm:$0xff] }
  0x63   : > { %5233 = vmatprep.mubr.msk.f32.mxu1 %vm202_vm0, %v6149_v5  ;;  %5457 = vmatprep.mubr.msk.f32.mxu0 %vm202_vm0, %v6506_v10  ;;  %v6531_v5 = vld [vmem:[%s6145_s9 + $0x144] sm:$0xff]  ;;  %7249 = vst [vmem:[#allocation28_spill] sm:$0xff] %v6562_v12 }
  0x66   : > { %5234 = vmatmul.mubr.msk.f32.gmra.mrb[4].mxu1 %vm202_vm0, %v6156_v7  ;;  %5458 = vmatmul.mubr.msk.f32.gmra.mrb[20].mxu0 %vm202_vm0, %v6517_v11  ;;  %v6545_v7 = vld [vmem:[%s6145_s9 + $0x15c] sm:$0xff] }
  0x67   : > { %5236 = vmatprep.mubr.msk.f32.mxu1 %vm202_vm0, %v6160_v9  ;;  %5460 = vmatprep.mubr.msk.f32.mxu0 %vm202_vm0, %v6520_v14  ;;  %7246 = vst [vmem:[#allocation25_spill] sm:$0xff] %v6545_v7  ;;  %v6548_v9 = vld [vmem:[%s6145_s9 + $0x16c] sm:$0xff] }
  0x68   : > { %7247 = vst [vmem:[#allocation26_spill] sm:$0xff] %v6548_v9 }
  0x6a   : > { %5237 = vmatmul.mubr.msk.f32.gmra.mrb[6].mxu1 %vm202_vm0, %v6178_v13  ;;  %5461 = vmatmul.mubr.msk.f32.gmra.mrb[22].mxu0 %vm202_vm0, %v6531_v5  ;;  %v6559_v13 = vld [vmem:[%s6145_s9 + $0x174] sm:$0xff] }
  0x6b   : > { %5239 = vmatprep.mubr.msk.f32.mxu1 %vm202_vm0, %v6186_v15  ;;  %5463 = vmatprep.mubr.msk.f32.mxu0 %vm202_vm0, %v6534_v18  ;;  %7248 = vst [vmem:[#allocation27_spill] sm:$0xff] %v6559_v13 }
  0x6e   : > { %5240 = vmatmul.mubr.msk.f32.gmra.mrb[8].mxu1 %vm202_vm0, %v6201_v17  ;;  %5464 = vmatmul.mubr.msk.f32.gmra.mrb[24].mxu0 %vm202_vm0, %v6545_v7  ;;  %v6573_v7 = vld [vmem:[%s6145_s9 + $0x18c] sm:$0xff] }
  0x6f   : > { %5242 = vmatprep.mubr.msk.f32.mxu1 %vm202_vm0, %v6207_v19  ;;  %5466 = vmatprep.mubr.msk.f32.mxu0 %vm202_vm0, %v6548_v9  ;;  %7250 = vst [vmem:[#allocation29_spill] sm:$0xff] %v6573_v7  ;;  %v6576_v9 = vld [vmem:[%s6145_s9 + $0x19c] sm:$0xff] }
  0x70   : > { %7251 = vst [vmem:[#allocation30_spill] sm:$0xff] %v6576_v9 }
  0x72   : > { %5243 = vmatmul.mubr.msk.f32.gmra.mrb[10].mxu1 %vm202_vm0, %v6221_v21  ;;  %5467 = vmatmul.mubr.msk.f32.gmra.mrb[26].mxu0 %vm202_vm0, %v6559_v13  ;;  %v6587_v13 = vld [vmem:[%s6145_s9 + $0x1a4] sm:$0xff] }
  0x73   : > { %5245 = vmatprep.mubr.msk.f32.mxu1 %vm202_vm0, %v6227_v23  ;;  %5469 = vmatprep.mubr.msk.f32.mxu0 %vm202_vm0, %v6562_v12  ;;  %7252 = vst [vmem:[#allocation31_spill] sm:$0xff] %v6587_v13  ;;  %v6627_v12 = vld [vmem:[%s6145_s9 + $0x10a] sm:$0xff] }
  0x76   : > { %5246 = vmatmul.mubr.msk.f32.gmra.mrb[12].mxu1 %vm202_vm0, %v6241_v25  ;;  %5470 = vmatmul.mubr.msk.f32.gmra.mrb[28].mxu0 %vm202_vm0, %v6573_v7  ;;  %v6624_v7 = vld [vmem:[%s6145_s9 + $0xfa] sm:$0xff] }
  0x77   : > { %5248 = vmatprep.mubr.msk.f32.mxu1 %vm202_vm0, %v6247_v27  ;;  %5472 = vmatprep.mubr.msk.f32.mxu0 %vm202_vm0, %v6576_v9  ;;  %v6604_v9 = vld [vmem:[%s7187_s1 + $0x40] sm:$0xff] }
  0x7a   : > { %5249 = vmatmul.mubr.msk.f32.gmra.mrb[14].mxu1 %vm202_vm0, %v6261_v29  ;;  %5473 = vmatmul.mubr.msk.f32.gmra.mrb[30].mxu0 %vm202_vm0, %v6587_v13  ;;  %v6611_v13 = vld [vmem:[%s6145_s9 + $0xf2] sm:$0xff] }
  0x7b   : > { %5251 = vmatprep.mubr.msk.f32.mxu1 %vm202_vm0, %v6267_v31  ;;  %5477 = vmatprep.mubr.msk.f32.mxu0 %vm202_vm0, %v6224_v22 }
  0x7e   : > { %5252 = vmatmul.mubr.msk.f32.gmra.mrb[16].mxu1 %vm202_vm0, %v6281_v33  ;;  %5478 = vmatmul.mubr.msk.f32.vlgmr.msra.gmra.mrb[0].mxu0 %vm202_vm0, %v6238_v24 }
  0x7f   : > { %5254 = vmatprep.mubr.msk.f32.mxu1 %vm202_vm0, %v6287_v35  ;;  %5480 = vmatprep.mubr.msk.f32.mxu0 %vm202_vm0, %v6244_v26 }
  0x80   : > { %5526 = vmatpush3.msra.mxu0 %v6336_v44  ;;  %v6638_v44 = vld [vmem:[%s6145_s9 + $0x112] sm:$0xff] }
  0x81   : > { %5575 = vmatprep.subr.mxu0 %v6604_v9 }
  0x82   : > { %5255 = vmatmul.mubr.msk.f32.gmra.mrb[18].mxu1 %vm202_vm0, %v6301_v37  ;;  %5481 = vmatmul.mubr.msk.f32.gmra.mrb[2].mxu0 %vm202_vm0, %v6258_v28  ;;  %v1009_v28 = vld [vmem:[%s6145_s9 + $0x1c] sm:$0xff] }
  0x83   : > { %5257 = vmatprep.mubr.msk.f32.mxu1 %vm202_vm0, %v6611_v13  ;;  %5483 = vmatprep.mubr.msk.f32.mxu0 %vm202_vm0, %v6264_v30  ;;  %v6641_v30 = vld [vmem:[%s6145_s9 + $0x122] sm:$0xff] }
  0x86   : > { %5258 = vmatmul.mubr.msk.f32.gmra.mrb[20].mxu1 %vm202_vm0, %v6624_v7  ;;  %5484 = vmatmul.mubr.msk.f32.gmra.mrb[4].mxu0 %vm202_vm0, %v6278_v32  ;;  %v6652_v32 = vld [vmem:[%s6145_s9 + $0x12a] sm:$0xff] }
  0x87   : > { %5260 = vmatprep.mubr.msk.f32.mxu1 %vm202_vm0, %v6627_v12  ;;  %5486 = vmatprep.mubr.msk.f32.mxu0 %vm202_vm0, %v6284_v34  ;;  %v6655_v34 = vld [vmem:[%s6145_s9 + $0x13a] sm:$0xff] }
  0x8a   : > { %5261 = vmatmul.mubr.msk.f32.gmra.mrb[22].mxu1 %vm202_vm0, %v6638_v44  ;;  %5487 = vmatmul.mubr.msk.f32.gmra.mrb[6].mxu0 %vm202_vm0, %v6298_v36  ;;  %v6666_v36 = vld [vmem:[%s6145_s9 + $0x142] sm:$0xff] }
  0x8b   : > { %5263 = vmatprep.mubr.msk.f32.mxu1 %vm202_vm0, %v6641_v30  ;;  %5489 = vmatprep.mubr.msk.f32.mxu0 %vm202_vm0, %v6304_v38  ;;  %v6669_v38 = vld [vmem:[%s6145_s9 + $0x152] sm:$0xff] }
  0x8e   : > { %5264 = vmatmul.mubr.msk.f32.gmra.mrb[24].mxu1 %vm202_vm0, %v6652_v32  ;;  %5490 = vmatmul.mubr.msk.f32.gmra.mrb[8].mxu0 %vm202_vm0, %v6318_v40  ;;  %v6680_v40 = vld [vmem:[%s6145_s9 + $0x15a] sm:$0xff] }
  0x8f   : > { %5266 = vmatprep.mubr.msk.f32.mxu1 %vm202_vm0, %v6655_v34  ;;  %5492 = vmatprep.mubr.msk.f32.mxu0 %vm202_vm0, %v6324_v42  ;;  %v6683_v42 = vld [vmem:[%s6145_s9 + $0x16a] sm:$0xff] }
  0x92   : > { %5267 = vmatmul.mubr.msk.f32.gmra.mrb[26].mxu1 %vm202_vm0, %v6666_v36  ;;  %5493 = vmatmul.mubr.msk.f32.gmra.mrb[10].mxu0 %vm202_vm0, %v6343_v45  ;;  %v6694_v45 = vld [vmem:[%s6145_s9 + $0x172] sm:$0xff] }
  0x93   : > { %5269 = vmatprep.mubr.msk.f32.mxu1 %vm202_vm0, %v6669_v38  ;;  %5495 = vmatprep.mubr.msk.f32.mxu0 %vm202_vm0, %v6349_v47  ;;  %v1007_v47 = vld [vmem:[%s6145_s9 + $0x4] sm:$0xff] }
  0x96   : > { %5270 = vmatmul.mubr.msk.f32.gmra.mrb[28].mxu1 %vm202_vm0, %v6680_v40  ;;  %5496 = vmatmul.mubr.msk.f32.gmra.mrb[12].mxu0 %vm202_vm0, %v6365_v49  ;;  %v1008_v49 = vld [vmem:[%s6145_s9 + $0xc] sm:$0xff] }
  0x97   : > { %5272 = vmatprep.mubr.msk.f32.mxu1 %vm202_vm0, %v6683_v42  ;;  %5498 = vmatprep.mubr.msk.f32.mxu0 %vm202_vm0, %v6371_v51  ;;  %v1010_v51 = vld [vmem:[%s6145_s9 + $0x24] sm:$0xff] }
  0x9a   : > { %5273 = vmatmul.mubr.msk.f32.gmra.mrb[30].mxu1 %vm202_vm0, %v6694_v45  ;;  %5499 = vmatmul.mubr.msk.f32.gmra.mrb[14].mxu0 %vm202_vm0, %v6385_v53 }
  0x9b   : > { %5277 = vmatprep.mubr.msk.f32.mxu1 %vm202_vm0, %v1007_v47  ;;  %5501 = vmatprep.mubr.msk.f32.mxu0 %vm202_vm0, %v6391_v55  ;;  %v4705_v47 = vld [vmem:[%s6145_s9 + $0x1b8] sm:$0xff] }
  0x9e   : > { %5278 = vmatmul.mubr.msk.f32.vlgmr.msra.gmra.mrb[0].mxu1 %vm202_vm0, %v1008_v49  ;;  %5502 = vmatmul.mubr.msk.f32.gmra.mrb[16].mxu0 %vm202_vm0, %v6405_v57  ;;  %v4706_v49 = vld [vmem:[%s6145_s9 + $0x1c8] sm:$0xff] }
  0x9f   : > { %5326 = vmatpush3.msra.mxu1 %v6492_v3  ;;  %5280 = vmatprep.mubr.msk.f32.mxu1 %vm202_vm0, %v1009_v28  ;;  %v6731_v28 = vld [vmem:[%s6145_s9 + $0x180] sm:$0xff] }
  0xa0   : > { %5504 = vmatprep.mubr.msk.f32.mxu0 %vm202_vm0, %v6411_v59  ;;  %5625 = vmatprep.subr.mxu1 %v6130_v1  ;;  %v7253_v3 = vld [vmem:[#allocation21_spill] sm:$0xff] }
  0xa2   : > { %5281 = vmatmul.mubr.msk.f32.gmra.mrb[2].mxu1 %vm202_vm0, %v1010_v51  ;;  %5505 = vmatmul.mubr.msk.f32.gmra.mrb[18].mxu0 %vm202_vm0, %v6425_v61  ;;  %v4707_v51 = vld [vmem:[%s6145_s9 + $0x1d0] sm:$0xff] }
  0xa3   : > { %5283 = vmatprep.mubr.msk.f32.mxu1 %vm202_vm0, %v6307_v39  ;;  %5507 = vmatprep.mubr.msk.f32.mxu0 %vm202_vm0, %v6431_v63  ;;  %v6742_v39 = vld [vmem:[%s6145_s9 + $0x188] sm:$0xff] }
  0xa6   : > { %5284 = vmatmul.mubr.msk.f32.gmra.mrb[4].mxu1 %vm202_vm0, %v6321_v41  ;;  %5508 = vmatmul.mubr.msk.f32.gmra.mrb[20].mxu0 %vm202_vm0, %v6445_v2  ;;  %v6745_v41 = vld [vmem:[%s6145_s9 + $0x198] sm:$0xff] }
  0xa7   : > { %5286 = vmatprep.mubr.msk.f32.mxu1 %vm202_vm0, %v6327_v43  ;;  %5510 = vmatprep.mubr.msk.f32.mxu0 %vm202_vm0, %v6451_v4  ;;  %v6756_v43 = vld [vmem:[%s6145_s9 + $0x1a0] sm:$0xff] }
  0xaa   : > { %5287 = vmatmul.mubr.msk.f32.gmra.mrb[6].mxu1 %vm202_vm0, %v6346_v46  ;;  %5511 = vmatmul.mubr.msk.f32.gmra.mrb[22].mxu0 %vm202_vm0, %v6465_v8  ;;  %v4704_v46 = vld [vmem:[%s6145_s9 + $0x1b0] sm:$0xff] }
  0xab   : > { %5289 = vmatprep.mubr.msk.f32.mxu1 %vm202_vm0, %v6352_v48  ;;  %5513 = vmatprep.mubr.msk.f32.mxu0 %vm202_vm0, %v6731_v28 }
  0xae   : > { %5290 = vmatmul.mubr.msk.f32.gmra.mrb[8].mxu1 %vm202_vm0, %v6368_v50  ;;  %5514 = vmatmul.mubr.msk.f32.gmra.mrb[24].mxu0 %vm202_vm0, %v6742_v39 }
  0xaf   : > { %5292 = vmatprep.mubr.msk.f32.mxu1 %vm202_vm0, %v6374_v52  ;;  %5516 = vmatprep.mubr.msk.f32.mxu0 %vm202_vm0, %v6745_v41 }
  0xb2   : > { %5293 = vmatmul.mubr.msk.f32.gmra.mrb[10].mxu1 %vm202_vm0, %v6388_v54  ;;  %5517 = vmatmul.mubr.msk.f32.gmra.mrb[26].mxu0 %vm202_vm0, %v6756_v43 }
  0xb3   : > { %5295 = vmatprep.mubr.msk.f32.mxu1 %vm202_vm0, %v6394_v56  ;;  %5519 = vmatprep.mubr.msk.f32.mxu0 %vm202_vm0, %v4704_v46  ;;  %v7254_v46 = vld [vmem:[#allocation22_spill] sm:$0xff] }
  0xb6   : > { %5296 = vmatmul.mubr.msk.f32.gmra.mrb[12].mxu1 %vm202_vm0, %v6408_v58  ;;  %5520 = vmatmul.mubr.msk.f32.gmra.mrb[28].mxu0 %vm202_vm0, %v4705_v47  ;;  %v7255_v47 = vld [vmem:[#allocation23_spill] sm:$0xff] }
  0xb7   : > { %5298 = vmatprep.mubr.msk.f32.mxu1 %vm202_vm0, %v6414_v60  ;;  %5522 = vmatprep.mubr.msk.f32.mxu0 %vm202_vm0, %v4706_v49  ;;  %v7268_v49 = vld [vmem:[#allocation13_spill] sm:$0xff] }
  0xba   : > { %5299 = vmatmul.mubr.msk.f32.gmra.mrb[14].mxu1 %vm202_vm0, %v6428_v62  ;;  %5523 = vmatmul.mubr.msk.f32.gmra.mrb[30].mxu0 %vm202_vm0, %v4707_v51  ;;  %v7269_v51 = vld [vmem:[#allocation14_spill] sm:$0xff] }
  0xbb   : > { %5301 = vmatprep.mubr.msk.f32.mxu1 %vm202_vm0, %v6434_v0  ;;  %5527 = vmatprep.mubr.msk.f32.mxu0 %vm202_vm0, %v6186_v15  ;;  %v7256_v15 = vld [vmem:[#allocation24_spill] sm:$0xff] }
  0xbe   : > { %5302 = vmatmul.mubr.msk.f32.gmra.mrb[16].mxu1 %vm202_vm0, %v7253_v3  ;;  %5528 = vmatmul.mubr.msk.f32.vlgmr.msra.gmra.mrb[0].mxu0 %vm202_vm0, %v6201_v17  ;;  %v7257_v17 = vld [vmem:[#allocation25_spill] sm:$0xff] }
  0xbf   : > { %5304 = vmatprep.mubr.msk.f32.mxu1 %vm202_vm0, %v7254_v46  ;;  %5530 = vmatprep.mubr.msk.f32.mxu0 %vm202_vm0, %v6207_v19  ;;  %v7258_v19 = vld [vmem:[#allocation26_spill] sm:$0xff] }
  0xc0   : > { %5576 = vmatpush3.msra.mxu0 %v6604_v9  ;;  %v4769_v9 = vld [vmem:[%s6145_s9 + $0x1b2] sm:$0xff] }
  0xc2   : > { %5305 = vmatmul.mubr.msk.f32.gmra.mrb[18].mxu1 %vm202_vm0, %v7255_v47  ;;  %5531 = vmatmul.mubr.msk.f32.gmra.mrb[2].mxu0 %vm202_vm0, %v6221_v21  ;;  %v7259_v21 = vld [vmem:[#allocation27_spill] sm:$0xff] }
  0xc3   : > { %5307 = vmatprep.mubr.msk.f32.mxu1 %vm202_vm0, %v7256_v15  ;;  %5533 = vmatprep.mubr.msk.f32.mxu0 %vm202_vm0, %v6227_v23  ;;  %v7260_v23 = vld [vmem:[#allocation5_spill] sm:$0xff] }
  0xc6   : > { %5308 = vmatmul.mubr.msk.f32.gmra.mrb[20].mxu1 %vm202_vm0, %v6483_v16  ;;  %5534 = vmatmul.mubr.msk.f32.gmra.mrb[4].mxu0 %vm202_vm0, %v6241_v25  ;;  %v7261_v25 = vld [vmem:[#allocation6_spill] sm:$0xff] }
  0xc7   : > { %5310 = vmatprep.mubr.msk.f32.mxu1 %vm202_vm0, %v6487_v6  ;;  %5536 = vmatprep.mubr.msk.f32.mxu0 %vm202_vm0, %v6247_v27  ;;  %v7262_v27 = vld [vmem:[#allocation7_spill] sm:$0xff] }
  0xca   : > { %5311 = vmatmul.mubr.msk.f32.gmra.mrb[22].mxu1 %vm202_vm0, %v6501_v20  ;;  %5537 = vmatmul.mubr.msk.f32.gmra.mrb[6].mxu0 %vm202_vm0, %v6261_v29  ;;  %v7263_v29 = vld [vmem:[#allocation8_spill] sm:$0xff] }
  0xcb   : > { %5313 = vmatprep.mubr.msk.f32.mxu1 %vm202_vm0, %v6506_v10  ;;  %5539 = vmatprep.mubr.msk.f32.mxu0 %vm202_vm0, %v6267_v31  ;;  %v6887_v31 = vld [vmem:[%s6145_s9 + $0x19a] sm:$0xff] }
  0xce   : > { %5314 = vmatmul.mubr.msk.f32.gmra.mrb[24].mxu1 %vm202_vm0, %v6517_v11  ;;  %5540 = vmatmul.mubr.msk.f32.gmra.mrb[8].mxu0 %vm202_vm0, %v6281_v33  ;;  %v7266_v33 = vld [vmem:[#allocation11_spill] sm:$0xff] }
  0xcf   : > { %5316 = vmatprep.mubr.msk.f32.mxu1 %vm202_vm0, %v6520_v14  ;;  %5542 = vmatprep.mubr.msk.f32.mxu0 %vm202_vm0, %v6287_v35  ;;  %v7267_v35 = vld [vmem:[#allocation12_spill] sm:$0xff] }
  0xd2   : > { %5317 = vmatmul.mubr.msk.f32.gmra.mrb[26].mxu1 %vm202_vm0, %v6531_v5  ;;  %5543 = vmatmul.mubr.msk.f32.gmra.mrb[10].mxu0 %vm202_vm0, %v6301_v37  ;;  %v6898_v37 = vld [vmem:[%s6145_s9 + $0x1a2] sm:$0xff] }
  0xd3   : > { %5319 = vmatprep.mubr.msk.f32.mxu1 %vm202_vm0, %v6534_v18  ;;  %5545 = vmatprep.mubr.msk.f32.mxu0 %vm202_vm0, %v6611_v13 }
  0xd6   : > { %5320 = vmatmul.mubr.msk.f32.gmra.mrb[28].mxu1 %vm202_vm0, %v7257_v17  ;;  %5546 = vmatmul.mubr.msk.f32.gmra.mrb[12].mxu0 %vm202_vm0, %v6624_v7 }
  0xd7   : > { %5322 = vmatprep.mubr.msk.f32.mxu1 %vm202_vm0, %v7258_v19  ;;  %5548 = vmatprep.mubr.msk.f32.mxu0 %vm202_vm0, %v6627_v12 }
  0xda   : > { %5323 = vmatmul.mubr.msk.f32.gmra.mrb[30].mxu1 %vm202_vm0, %v7259_v21  ;;  %5549 = vmatmul.mubr.msk.f32.gmra.mrb[14].mxu0 %vm202_vm0, %v6638_v44 }
  0xdb   : > { %5327 = vmatprep.mubr.msk.f32.mxu1 %vm202_vm0, %v7260_v23  ;;  %5551 = vmatprep.mubr.msk.f32.mxu0 %vm202_vm0, %v6641_v30  ;;  %v4770_v23 = vld [vmem:[%s6145_s9 + $0x1ba] sm:$0xff] }
  0xde   : > { %5328 = vmatmul.mubr.msk.f32.vlgmr.msra.gmra.mrb[0].mxu1 %vm202_vm0, %v7261_v25  ;;  %5552 = vmatmul.mubr.msk.f32.gmra.mrb[16].mxu0 %vm202_vm0, %v6652_v32  ;;  %v4771_v25 = vld [vmem:[%s6145_s9 + $0x1ca] sm:$0xff] }
  0xdf   : > { %5626 = vmatpush3.msra.mxu1 %v6130_v1  ;;  %5330 = vmatprep.mubr.msk.f32.mxu1 %vm202_vm0, %v7262_v27  ;;  %v6873_v1 = vld [vmem:[%s6145_s9 + $0x182] sm:$0xff]  ;;  %v7270_v27 = vld [vmem:[#allocation15_spill] sm:$0xff] }
  0xe0   : > { %5554 = vmatprep.mubr.msk.f32.mxu0 %vm202_vm0, %v6655_v34 }
  0xe2   : > { %5331 = vmatmul.mubr.msk.f32.gmra.mrb[2].mxu1 %vm202_vm0, %v7263_v29  ;;  %5555 = vmatmul.mubr.msk.f32.gmra.mrb[18].mxu0 %vm202_vm0, %v6666_v36  ;;  %v7271_v29 = vld [vmem:[#allocation16_spill] sm:$0xff] }
  0xe3   : > { %5333 = vmatprep.mubr.msk.f32.mxu1 %vm202_vm0, %v6224_v22  ;;  %5557 = vmatprep.mubr.msk.f32.mxu0 %vm202_vm0, %v6669_v38  ;;  %v7264_v22 = vld [vmem:[#allocation9_spill] sm:$0xff] }
  0xe6   : > { %5334 = vmatmul.mubr.msk.f32.gmra.mrb[4].mxu1 %vm202_vm0, %v6238_v24  ;;  %5558 = vmatmul.mubr.msk.f32.gmra.mrb[20].mxu0 %vm202_vm0, %v6680_v40  ;;  %v7265_v24 = vld [vmem:[#allocation10_spill] sm:$0xff] }
  0xe7   : > { %5336 = vmatprep.mubr.msk.f32.mxu1 %vm202_vm0, %v6244_v26  ;;  %5560 = vmatprep.mubr.msk.f32.mxu0 %vm202_vm0, %v6683_v42  ;;  %v6884_v26 = vld [vmem:[%s6145_s9 + $0x18a] sm:$0xff] }
  0xea   : > { %5337 = vmatmul.mubr.msk.f32.gmra.mrb[6].mxu1 %vm202_vm0, %v7264_v22  ;;  %5561 = vmatmul.mubr.msk.f32.gmra.mrb[22].mxu0 %vm202_vm0, %v6694_v45  ;;  %v4772_v22 = vld [vmem:[%s6145_s9 + $0x1d2] sm:$0xff] }
  0xeb   : > { %5339 = vmatprep.mubr.msk.f32.mxu1 %vm202_vm0, %v7265_v24  ;;  %5563 = vmatprep.mubr.msk.f32.mxu0 %vm202_vm0, %v6873_v1  ;;  %v7272_v24 = vld [vmem:[#allocation17_spill] sm:$0xff] }
  0xee   : > { %5340 = vmatmul.mubr.msk.f32.gmra.mrb[8].mxu1 %vm202_vm0, %v7266_v33  ;;  %5564 = vmatmul.mubr.msk.f32.gmra.mrb[24].mxu0 %vm202_vm0, %v6884_v26  ;;  %v7273_v33 = vld [vmem:[#allocation18_spill] sm:$0xff] }
  0xef   : > { %5342 = vmatprep.mubr.msk.f32.mxu1 %vm202_vm0, %v7267_v35  ;;  %5566 = vmatprep.mubr.msk.f32.mxu0 %vm202_vm0, %v6887_v31  ;;  %v7274_v35 = vld [vmem:[#allocation19_spill] sm:$0xff] }
  0xf2   : > { %5343 = vmatmul.mubr.msk.f32.gmra.mrb[10].mxu1 %vm202_vm0, %v7268_v49  ;;  %5567 = vmatmul.mubr.msk.f32.gmra.mrb[26].mxu0 %vm202_vm0, %v6898_v37 }
  0xf3   : > { %5345 = vmatprep.mubr.msk.f32.mxu1 %vm202_vm0, %v7269_v51  ;;  %5569 = vmatprep.mubr.msk.f32.mxu0 %vm202_vm0, %v4769_v9  ;;  %v7275_v9 = vld [vmem:[#allocation20_spill] sm:$0xff] }
  0xf6   : > { %5346 = vmatmul.mubr.msk.f32.gmra.mrb[12].mxu1 %vm202_vm0, %v7270_v27  ;;  %5570 = vmatmul.mubr.msk.f32.gmra.mrb[28].mxu0 %vm202_vm0, %v4770_v23 }
  0xf7   : > { %5348 = vmatprep.mubr.msk.f32.mxu1 %vm202_vm0, %v7271_v29  ;;  %5572 = vmatprep.mubr.msk.f32.mxu0 %vm202_vm0, %v4771_v25 }
  0xfa   : > { %5349 = vmatmul.mubr.msk.f32.gmra.mrb[14].mxu1 %vm202_vm0, %v7272_v24  ;;  %5573 = vmatmul.mubr.msk.f32.gmra.mrb[30].mxu0 %vm202_vm0, %v4772_v22 }
  0xfb   : > { %5351 = vmatprep.mubr.msk.f32.mxu1 %vm202_vm0, %v7273_v33  ;;  %5577 = vmatprep.mubr.msk.f32.mxu0 %vm202_vm0, %v6352_v48 }
  0xfe   : > { %5352 = vmatmul.mubr.msk.f32.gmra.mrb[16].mxu1 %vm202_vm0, %v7274_v35  ;;  %5578 = vmatmul.mubr.msk.f32.vlgmr.msra.gmra.mrb[0].mxu0 %vm202_vm0, %v6368_v50 }
  0xff   : > { %5354 = vmatprep.mubr.msk.f32.mxu1 %vm202_vm0, %v7275_v9  ;;  %5580 = vmatprep.mubr.msk.f32.mxu0 %vm202_vm0, %v6374_v52 }
 0x102   : > { %5355 = vmatmul.mubr.msk.f32.gmra.mrb[18].mxu1 %vm202_vm0, %v6385_v53  ;;  %5581 = vmatmul.mubr.msk.f32.gmra.mrb[2].mxu0 %vm202_vm0, %v6388_v54 }
 0x103   : > { %5357 = vmatprep.mubr.msk.f32.mxu1 %vm202_vm0, %v6391_v55  ;;  %5583 = vmatprep.mubr.msk.f32.mxu0 %vm202_vm0, %v6394_v56 }
 0x106   : > { %5358 = vmatmul.mubr.msk.f32.gmra.mrb[20].mxu1 %vm202_vm0, %v6405_v57  ;;  %5584 = vmatmul.mubr.msk.f32.gmra.mrb[4].mxu0 %vm202_vm0, %v6408_v58 }
 0x107   : > { %5360 = vmatprep.mubr.msk.f32.mxu1 %vm202_vm0, %v6411_v59  ;;  %5586 = vmatprep.mubr.msk.f32.mxu0 %vm202_vm0, %v6414_v60 }
 0x10a   : > { %5361 = vmatmul.mubr.msk.f32.gmra.mrb[22].mxu1 %vm202_vm0, %v6425_v61  ;;  %5587 = vmatmul.mubr.msk.f32.gmra.mrb[6].mxu0 %vm202_vm0, %v6428_v62 }
 0x10b   : > { %5363 = vmatprep.mubr.msk.f32.mxu1 %vm202_vm0, %v6431_v63  ;;  %5589 = vmatprep.mubr.msk.f32.mxu0 %vm202_vm0, %v6434_v0 }
 0x10e   : > { %5364 = vmatmul.mubr.msk.f32.gmra.mrb[24].mxu1 %vm202_vm0, %v6445_v2  ;;  %5590 = vmatmul.mubr.msk.f32.gmra.mrb[8].mxu0 %vm202_vm0, %v7253_v3  ;;  %v7060_v2 = vld [vmem:[%s7188_s2] ss:$0 sm:$0xff] }
 0x10f   : > { %5366 = vmatprep.mubr.msk.f32.mxu1 %vm202_vm0, %v6451_v4  ;;  %5592 = vmatprep.mubr.msk.f32.mxu0 %vm202_vm0, %v7254_v46 }
 0x112   : > { %5367 = vmatmul.mubr.msk.f32.gmra.mrb[26].mxu1 %vm202_vm0, %v6465_v8  ;;  %5593 = vmatmul.mubr.msk.f32.gmra.mrb[10].mxu0 %vm202_vm0, %v7255_v47 }
 0x113   : > { %5369 = vmatprep.mubr.msk.f32.mxu1 %vm202_vm0, %v6731_v28  ;;  %5595 = vmatprep.mubr.msk.f32.mxu0 %vm202_vm0, %v7256_v15 }
 0x116   : > { %5370 = vmatmul.mubr.msk.f32.gmra.mrb[28].mxu1 %vm202_vm0, %v6742_v39  ;;  %5596 = vmatmul.mubr.msk.f32.gmra.mrb[12].mxu0 %vm202_vm0, %v6483_v16  ;;  %v7276_v16 = vld [vmem:[#allocation28_spill] sm:$0xff] }
 0x117   : > { %5372 = vmatprep.mubr.msk.f32.mxu1 %vm202_vm0, %v6745_v41  ;;  %5598 = vmatprep.mubr.msk.f32.mxu0 %vm202_vm0, %v6487_v6 }
 0x11a   : > { %5373 = vmatmul.mubr.msk.f32.gmra.mrb[30].mxu1 %vm202_vm0, %v6756_v43  ;;  %5599 = vmatmul.mubr.msk.f32.gmra.mrb[14].mxu0 %vm202_vm0, %v6501_v20  ;;  %v7277_v20 = vld [vmem:[#allocation29_spill] sm:$0xff] }
 0x11b   : > { %5401 = vmatprep.mubr.msk.f32.mxu1 %vm202_vm0, %v6611_v13  ;;  %5601 = vmatprep.mubr.msk.f32.mxu0 %vm202_vm0, %v6506_v10 }
 0x11e   : > { %5402 = vmatmul.mubr.msk.f32.vlgmr.msra.gmra.mrb[16].mxu1 %vm202_vm0, %v6624_v7  ;;  %5602 = vmatmul.mubr.msk.f32.gmra.mrb[16].mxu0 %vm202_vm0, %v6517_v11 }
 0x11f   : > { %5404 = vmatprep.mubr.msk.f32.mxu1 %vm202_vm0, %v6627_v12  ;;  %5604 = vmatprep.mubr.msk.f32.mxu0 %vm202_vm0, %v6520_v14 }
 0x122   : > { %5405 = vmatmul.mubr.msk.f32.gmra.mrb[18].mxu1 %vm202_vm0, %v6638_v44  ;;  %5605 = vmatmul.mubr.msk.f32.gmra.mrb[18].mxu0 %vm202_vm0, %v6531_v5 }
 0x123   : > { %5407 = vmatprep.mubr.msk.f32.mxu1 %vm202_vm0, %v6641_v30  ;;  %5607 = vmatprep.mubr.msk.f32.mxu0 %vm202_vm0, %v6534_v18  ;;  %v7278_v30 = vld [vmem:[#allocation30_spill] sm:$0xff] }
 0x126   : > { %5408 = vmatmul.mubr.msk.f32.gmra.mrb[20].mxu1 %vm202_vm0, %v6652_v32  ;;  %5608 = vmatmul.mubr.msk.f32.gmra.mrb[20].mxu0 %vm202_vm0, %v7257_v17  ;;  %v4834_v32 = vld [vmem:[%s6145_s9 + $0x1b4] sm:$0xff] }
 0x127   : > { %5410 = vmatprep.mubr.msk.f32.mxu1 %vm202_vm0, %v6655_v34  ;;  %5610 = vmatprep.mubr.msk.f32.mxu0 %vm202_vm0, %v7258_v19  ;;  %v7279_v34 = vld [vmem:[#allocation31_spill] sm:$0xff] }
 0x12a   : > { %5411 = vmatmul.mubr.msk.f32.gmra.mrb[22].mxu1 %vm202_vm0, %v6666_v36  ;;  %5611 = vmatmul.mubr.msk.f32.gmra.mrb[22].mxu0 %vm202_vm0, %v7259_v21  ;;  %v4835_v36 = vld [vmem:[%s6145_s9 + $0x1bc] sm:$0xff] }
 0x12b   : > { %5413 = vmatprep.mubr.msk.f32.mxu1 %vm202_vm0, %v6669_v38  ;;  %5613 = vmatprep.mubr.msk.f32.mxu0 %vm202_vm0, %v7276_v16  ;;  %v4836_v38 = vld [vmem:[%s6145_s9 + $0x1cc] sm:$0xff] }
 0x12e   : > { %5414 = vmatmul.mubr.msk.f32.gmra.mrb[24].mxu1 %vm202_vm0, %v6680_v40  ;;  %5614 = vmatmul.mubr.msk.f32.gmra.mrb[24].mxu0 %vm202_vm0, %v7277_v20  ;;  %v4837_v40 = vld [vmem:[%s6145_s9 + $0x1d4] sm:$0xff] }
 0x12f   : > { %5416 = vmatprep.mubr.msk.f32.mxu1 %vm202_vm0, %v6683_v42  ;;  %5616 = vmatprep.mubr.msk.f32.mxu0 %vm202_vm0, %v7278_v30 }
 0x132   : > { %5417 = vmatmul.mubr.msk.f32.gmra.mrb[26].mxu1 %vm202_vm0, %v6694_v45  ;;  %5617 = vmatmul.mubr.msk.f32.gmra.mrb[26].mxu0 %vm202_vm0, %v7279_v34 }
 0x133   : > { %5419 = vmatprep.mubr.msk.f32.mxu1 %vm202_vm0, %v6873_v1  ;;  %5619 = vmatprep.mubr.msk.f32.mxu0 %vm202_vm0, %v4834_v32 }
 0x136   : > { %5420 = vmatmul.mubr.msk.f32.gmra.mrb[28].mxu1 %vm202_vm0, %v6884_v26  ;;  %5620 = vmatmul.mubr.msk.f32.gmra.mrb[28].mxu0 %vm202_vm0, %v4835_v36 }
 0x137   : > { %5422 = vmatprep.mubr.msk.f32.mxu1 %vm202_vm0, %v6887_v31  ;;  %5622 = vmatprep.mubr.msk.f32.mxu0 %vm202_vm0, %v4836_v38 }
 0x13a   : > { %5423 = vmatmul.mubr.msk.f32.gmra.mrb[30].mxu1 %vm202_vm0, %v6898_v37  ;;  %5623 = vmatmul.mubr.msk.f32.gmra.mrb[30].mxu0 %vm202_vm0, %v4837_v40 }
 0x1b1   : > { %v5329_v42 = vpop.f32.mrb[0].mxu1 }
 0x1b2   : > { %v1655_v45 = vpop.f32.mrb[1].mxu1 }
 0x1b5   : > { %v5332_v48 = vpop.f32.mrb[2].mxu1 }
 0x1b6   : > { %v1665_v50 = vpop.f32.mrb[3].mxu1 }
 0x1b9   : > { %v5335_v52 = vpop.f32.mrb[4].mxu1 }
 0x1ba   : > { %v1675_v53 = vpop.f32.mrb[5].mxu1 }
 0x1bd   : > { %v5338_v54 = vpop.f32.mrb[6].mxu1 }
 0x1be   : > { %v1685_v55 = vpop.f32.mrb[7].mxu1 }
 0x1c1   : > { %v5341_v56 = vpop.f32.mrb[8].mxu1 }
 0x1c2   : > { %v1695_v57 = vpop.f32.mrb[9].mxu1 }
 0x1c5   : > { %v5344_v58 = vpop.f32.mrb[10].mxu1 }
 0x1c6   : > { %v1705_v59 = vpop.f32.mrb[11].mxu1 }
 0x1c9   : > { %v7048_v60 = vpop.f32.mrb[12].mxu1 }
 0x1ca   : > { %v7050_v61 = vpop.f32.mrb[13].mxu1 }
 0x1cd   : > { %v7052_v62 = vpop.f32.mrb[14].mxu1 }
 0x1ce   : > { %v7054_v63 = vpop.f32.mrb[15].mxu1 }
 0x1d1   : > { %v5579_v0 = vpop.f32.mrb[0].mxu0 }
 0x1d2   : > { %v5629_v4 = vadd.f32 %v5579_v0, %v5329_v42  ;;  %v3911_v6 = vpop.f32.mrb[1].mxu0 }
 0x1d3   : > { %v5632_v8 = vadd.f32 %v3911_v6, %v1655_v45 }
 0x1d4   : > { %v4206_v10 = vadd.f32 %v5629_v4, %v7060_v2 }
 0x1d5   : > { %v4205_v11 = vadd.f32 %v5632_v8, %v7060_v2  ;;  %v5582_v14 = vpop.f32.mrb[2].mxu0 }
 0x1d6   : > { %v4238_v5 = vmax.f32 %v4206_v10, 0.0  ;;  %v5635_v18 = vadd.f32 %v5582_v14, %v5332_v48  ;;  %v3921_v7 = vpop.f32.mrb[3].mxu0 }
 0x1d7   : > { %v4237_v13 = vmax.f32 %v4205_v11, 0.0  ;;  %v5638_v12 = vadd.f32 %v3921_v7, %v1665_v50 }
 0x1d8   : > { %4270 = vst [vmem:[%s7066_s6 + $0x8] sm:$0xff] %v4238_v5  ;;  %v4208_v44 = vadd.f32 %v5635_v18, %v7060_v2 }
 0x1d9   : > { %4269 = vst [vmem:[%s7066_s6] sm:$0xff] %v4237_v13  ;;  %v4207_v28 = vadd.f32 %v5638_v12, %v7060_v2  ;;  %v5585_v39 = vpop.f32.mrb[4].mxu0 }
 0x1da   : > { %v4240_v41 = vmax.f32 %v4208_v44, 0.0  ;;  %v5641_v43 = vadd.f32 %v5585_v39, %v5335_v52  ;;  %v3931_v3 = vpop.f32.mrb[5].mxu0 }
 0x1db   : > { %v4239_v46 = vmax.f32 %v4207_v28, 0.0  ;;  %v5644_v47 = vadd.f32 %v3931_v3, %v1675_v53 }
 0x1dc   : > { %4272 = vst [vmem:[%s7066_s6 + $0x18] sm:$0xff] %v4240_v41  ;;  %v4210_v15 = vadd.f32 %v5641_v43, %v7060_v2 }
 0x1dd   : > { %4271 = vst [vmem:[%s7066_s6 + $0x10] sm:$0xff] %v4239_v46  ;;  %v4209_v17 = vadd.f32 %v5644_v47, %v7060_v2  ;;  %v5588_v19 = vpop.f32.mrb[6].mxu0 }
 0x1de   : > { %v4242_v21 = vmax.f32 %v4210_v15, 0.0  ;;  %v5647_v1 = vadd.f32 %v5588_v19, %v5338_v54  ;;  %v3941_v26 = vpop.f32.mrb[7].mxu0 }
 0x1df   : > { %v4241_v31 = vmax.f32 %v4209_v17, 0.0  ;;  %v5650_v37 = vadd.f32 %v3941_v26, %v1685_v55 }
 0x1e0   : > { %4274 = vst [vmem:[%s7066_s6 + $0x28] sm:$0xff] %v4242_v21  ;;  %v4212_v49 = vadd.f32 %v5647_v1, %v7060_v2 }
 0x1e1   : > { %4273 = vst [vmem:[%s7066_s6 + $0x20] sm:$0xff] %v4241_v31  ;;  %v4211_v51 = vadd.f32 %v5650_v37, %v7060_v2  ;;  %v5591_v23 = vpop.f32.mrb[8].mxu0 }
 0x1e2   : > { %v4244_v25 = vmax.f32 %v4212_v49, 0.0  ;;  %v5653_v27 = vadd.f32 %v5591_v23, %v5341_v56  ;;  %v3951_v29 = vpop.f32.mrb[9].mxu0 }
 0x1e3   : > { %v4243_v22 = vmax.f32 %v4211_v51, 0.0  ;;  %v5656_v24 = vadd.f32 %v3951_v29, %v1695_v57 }
 0x1e4   : > { %4276 = vst [vmem:[%s7066_s6 + $0x38] sm:$0xff] %v4244_v25  ;;  %v4214_v33 = vadd.f32 %v5653_v27, %v7060_v2 }
 0x1e5   : > { %4275 = vst [vmem:[%s7066_s6 + $0x30] sm:$0xff] %v4243_v22  ;;  %v4213_v35 = vadd.f32 %v5656_v24, %v7060_v2  ;;  %v5594_v9 = vpop.f32.mrb[10].mxu0 }
 0x1e6   : > { %v4246_v16 = vmax.f32 %v4214_v33, 0.0  ;;  %v5659_v20 = vadd.f32 %v5594_v9, %v5344_v58  ;;  %v3961_v30 = vpop.f32.mrb[11].mxu0 }
 0x1e7   : > { %v4245_v32 = vmax.f32 %v4213_v35, 0.0  ;;  %v5662_v34 = vadd.f32 %v3961_v30, %v1705_v59 }
 0x1e8   : > { %4278 = vst [vmem:[%s7066_s6 + $0x48] sm:$0xff] %v4246_v16  ;;  %v4216_v36 = vadd.f32 %v5659_v20, %v7060_v2 }
 0x1e9   : > { %4277 = vst [vmem:[%s7066_s6 + $0x40] sm:$0xff] %v4245_v32  ;;  %v4215_v38 = vadd.f32 %v5662_v34, %v7060_v2  ;;  %v5597_v40 = vpop.f32.mrb[12].mxu0 }
 0x1ea   : > { %v4248_v42 = vmax.f32 %v4216_v36, 0.0  ;;  %v5665_v45 = vadd.f32 %v5597_v40, %v7048_v60  ;;  %v3971_v48 = vpop.f32.mrb[13].mxu0 }
 0x1eb   : > { %v4247_v50 = vmax.f32 %v4215_v38, 0.0  ;;  %v5668_v52 = vadd.f32 %v3971_v48, %v7050_v61 }
 0x1ec   : > { %4280 = vst [vmem:[%s7066_s6 + $0x58] sm:$0xff] %v4248_v42  ;;  %v4218_v53 = vadd.f32 %v5665_v45, %v7060_v2 }
 0x1ed   : > { %4279 = vst [vmem:[%s7066_s6 + $0x50] sm:$0xff] %v4247_v50  ;;  %v4217_v54 = vadd.f32 %v5668_v52, %v7060_v2  ;;  %v5600_v55 = vpop.f32.mrb[14].mxu0 }
 0x1ee   : > { %v4250_v56 = vmax.f32 %v4218_v53, 0.0  ;;  %v5671_v57 = vadd.f32 %v5600_v55, %v7052_v62  ;;  %v3981_v58 = vpop.f32.mrb[15].mxu0 }
 0x1ef   : > { %v4249_v59 = vmax.f32 %v4217_v54, 0.0  ;;  %v5674_v60 = vadd.f32 %v3981_v58, %v7054_v63 }
 0x1f0   : > { %4282 = vst [vmem:[%s7066_s6 + $0x68] sm:$0xff] %v4250_v56  ;;  %v4220_v0 = vadd.f32 %v5671_v57, %v7060_v2 }
 0x1f1   : > { %4281 = vst [vmem:[%s7066_s6 + $0x60] sm:$0xff] %v4249_v59  ;;  %v4219_v61 = vadd.f32 %v5674_v60, %v7060_v2  ;;  %v5403_v4 = vpop.f32.mrb[16].mxu1  ;;  %v5603_v6 = vpop.f32.mrb[16].mxu0 }
 0x1f2   : > { %v4252_v8 = vmax.f32 %v4220_v0, 0.0  ;;  %v5677_v10 = vadd.f32 %v5603_v6, %v5403_v4  ;;  %v2186_v11 = vpop.f32.mrb[17].mxu1  ;;  %v3991_v14 = vpop.f32.mrb[17].mxu0 }
 0x1f3   : > { %v4251_v62 = vmax.f32 %v4219_v61, 0.0  ;;  %v5680_v5 = vadd.f32 %v3991_v14, %v2186_v11 }
 0x1f4   : > { %4284 = vst [vmem:[%s7066_s6 + $0x78] sm:$0xff] %v4252_v8  ;;  %v4222_v18 = vadd.f32 %v5677_v10, %v7060_v2 }
 0x1f5   : > { %4283 = vst [vmem:[%s7066_s6 + $0x70] sm:$0xff] %v4251_v62  ;;  %v4221_v63 = vadd.f32 %v5680_v5, %v7060_v2  ;;  %v5406_v7 = vpop.f32.mrb[18].mxu1  ;;  %v5606_v13 = vpop.f32.mrb[18].mxu0 }
 0x1f6   : > { %v4254_v12 = vmax.f32 %v4222_v18, 0.0  ;;  %v5683_v44 = vadd.f32 %v5606_v13, %v5406_v7  ;;  %v2196_v28 = vpop.f32.mrb[19].mxu1  ;;  %v4001_v39 = vpop.f32.mrb[19].mxu0 }
 0x1f7   : > { %v4253_v41 = vmax.f32 %v4221_v63, 0.0  ;;  %v5686_v43 = vadd.f32 %v4001_v39, %v2196_v28 }
 0x1f8   : > { %4286 = vst [vmem:[%s7066_s6 + $0x88] sm:$0xff] %v4254_v12  ;;  %v4224_v3 = vadd.f32 %v5683_v44, %v7060_v2 }
 0x1f9   : > { %4285 = vst [vmem:[%s7066_s6 + $0x80] sm:$0xff] %v4253_v41  ;;  %v4223_v46 = vadd.f32 %v5686_v43, %v7060_v2  ;;  %v5409_v47 = vpop.f32.mrb[20].mxu1  ;;  %v5609_v15 = vpop.f32.mrb[20].mxu0 }
 0x1fa   : > { %v4256_v17 = vmax.f32 %v4224_v3, 0.0  ;;  %v5689_v19 = vadd.f32 %v5609_v15, %v5409_v47  ;;  %v2206_v21 = vpop.f32.mrb[21].mxu1  ;;  %v4011_v1 = vpop.f32.mrb[21].mxu0 }
 0x1fb   : > { %v4255_v26 = vmax.f32 %v4223_v46, 0.0  ;;  %v5692_v31 = vadd.f32 %v4011_v1, %v2206_v21 }
 0x1fc   : > { %4288 = vst [vmem:[%s7066_s6 + $0x98] sm:$0xff] %v4256_v17  ;;  %v4226_v37 = vadd.f32 %v5689_v19, %v7060_v2 }
 0x1fd   : > { %4287 = vst [vmem:[%s7066_s6 + $0x90] sm:$0xff] %v4255_v26  ;;  %v4225_v49 = vadd.f32 %v5692_v31, %v7060_v2  ;;  %v5412_v51 = vpop.f32.mrb[22].mxu1  ;;  %v5612_v23 = vpop.f32.mrb[22].mxu0 }
 0x1fe   : > { %v4258_v25 = vmax.f32 %v4226_v37, 0.0  ;;  %v5695_v27 = vadd.f32 %v5612_v23, %v5412_v51  ;;  %v2216_v29 = vpop.f32.mrb[23].mxu1  ;;  %v4021_v22 = vpop.f32.mrb[23].mxu0 }
 0x1ff   : > { %v4257_v24 = vmax.f32 %v4225_v49, 0.0  ;;  %v5698_v33 = vadd.f32 %v4021_v22, %v2216_v29 }
 0x200   : > { %4290 = vst [vmem:[%s7066_s6 + $0xa8] sm:$0xff] %v4258_v25  ;;  %v4228_v35 = vadd.f32 %v5695_v27, %v7060_v2 }
 0x201   : > { %4289 = vst [vmem:[%s7066_s6 + $0xa0] sm:$0xff] %v4257_v24  ;;  %v4227_v9 = vadd.f32 %v5698_v33, %v7060_v2  ;;  %v5415_v16 = vpop.f32.mrb[24].mxu1  ;;  %v5615_v20 = vpop.f32.mrb[24].mxu0 }
 0x202   : > { %v4260_v30 = vmax.f32 %v4228_v35, 0.0  ;;  %v5701_v32 = vadd.f32 %v5615_v20, %v5415_v16  ;;  %v2226_v34 = vpop.f32.mrb[25].mxu1  ;;  %v4031_v36 = vpop.f32.mrb[25].mxu0 }
 0x203   : > { %v4259_v38 = vmax.f32 %v4227_v9, 0.0  ;;  %v5704_v40 = vadd.f32 %v4031_v36, %v2226_v34 }
 0x204   : > { %4292 = vst [vmem:[%s7066_s6 + $0xb8] sm:$0xff] %v4260_v30  ;;  %v4230_v42 = vadd.f32 %v5701_v32, %v7060_v2 }
 0x205   : > { %4291 = vst [vmem:[%s7066_s6 + $0xb0] sm:$0xff] %v4259_v38  ;;  %v4229_v45 = vadd.f32 %v5704_v40, %v7060_v2  ;;  %v5418_v48 = vpop.f32.mrb[26].mxu1  ;;  %v5618_v50 = vpop.f32.mrb[26].mxu0 }
 0x206   : > { %v4262_v52 = vmax.f32 %v4230_v42, 0.0  ;;  %v5707_v53 = vadd.f32 %v5618_v50, %v5418_v48  ;;  %v2236_v54 = vpop.f32.mrb[27].mxu1  ;;  %v4041_v55 = vpop.f32.mrb[27].mxu0 }
 0x207   : > { %v4261_v56 = vmax.f32 %v4229_v45, 0.0  ;;  %v5710_v57 = vadd.f32 %v4041_v55, %v2236_v54 }
 0x208   : > { %4294 = vst [vmem:[%s7066_s6 + $0xc8] sm:$0xff] %v4262_v52  ;;  %v4232_v58 = vadd.f32 %v5707_v53, %v7060_v2 }
 0x209   : > { %4293 = vst [vmem:[%s7066_s6 + $0xc0] sm:$0xff] %v4261_v56  ;;  %v4231_v59 = vadd.f32 %v5710_v57, %v7060_v2  ;;  %v5421_v60 = vpop.f32.mrb[28].mxu1  ;;  %v5621_v0 = vpop.f32.mrb[28].mxu0 }
 0x20a   : > { %v4264_v61 = vmax.f32 %v4232_v58, 0.0  ;;  %v5713_v4 = vadd.f32 %v5621_v0, %v5421_v60  ;;  %v2246_v6 = vpop.f32.mrb[29].mxu1  ;;  %v4051_v8 = vpop.f32.mrb[29].mxu0 }
 0x20b   : > { %v4263_v10 = vmax.f32 %v4231_v59, 0.0  ;;  %v5716_v11 = vadd.f32 %v4051_v8, %v2246_v6 }
 0x20c   : > { %4296 = vst [vmem:[%s7066_s6 + $0xd8] sm:$0xff] %v4264_v61  ;;  %v4234_v14 = vadd.f32 %v5713_v4, %v7060_v2 }
 0x20d   : > { %4295 = vst [vmem:[%s7066_s6 + $0xd0] sm:$0xff] %v4263_v10  ;;  %v4233_v62 = vadd.f32 %v5716_v11, %v7060_v2  ;;  %v5424_v5 = vpop.f32.mrb[30].mxu1  ;;  %v5624_v18 = vpop.f32.mrb[30].mxu0 }
 0x20e   : > { %v4266_v63 = vmax.f32 %v4234_v14, 0.0  ;;  %v5719_v7 = vadd.f32 %v5624_v18, %v5424_v5  ;;  %v2256_v13 = vpop.f32.mrb[31].mxu1  ;;  %v4061_v12 = vpop.f32.mrb[31].mxu0 }
 0x20f   : > { %v4265_v44 = vmax.f32 %v4233_v62, 0.0  ;;  %v5722_v28 = vadd.f32 %v4061_v12, %v2256_v13 }
 0x210   : > { %4298 = vst [vmem:[%s7066_s6 + $0xe8] sm:$0xff] %v4266_v63  ;;  %v4236_v39 = vadd.f32 %v5719_v7, %v7060_v2 }
 0x211   : > { %4297 = vst [vmem:[%s7066_s6 + $0xe0] sm:$0xff] %v4265_v44  ;;  %v4235_v41 = vadd.f32 %v5722_v28, %v7060_v2 }
 0x212   : > { %v4268_v43 = vmax.f32 %v4236_v39, 0.0 }
 0x213   : > { %v4267_v3 = vmax.f32 %v4235_v41, 0.0 }
 0x214   : > { %4300 = vst [vmem:[%s7066_s6 + $0xf8] sm:$0xff] %v4268_v43 }
 0x215   : > { %4299 = vst [vmem:[%s7066_s6 + $0xf0] sm:$0xff] %v4267_v3 }
 0x216   : > { %6002 = shalt.err (!%p5999_p3)
}
 0x217   : > { %s6003_s25 = scalar_lea.hbm %s7137_s11, 4096  ;;  %s6007_s28 = scalar_lea.hbm %s7189_s3, 8192 }
 0x218   : > { %p6004_p4 = scmp.ne.s32.totalorder %s7137_s11, %s6003_s25  ;;  %p6008_p9 = scmp.lt.u32.totalorder %s7137_s11, %s7189_s3 }
 0x219   : > { %p6009_p10 = scmp.lt.u32.totalorder %s6007_s28, %s6003_s25  ;;  %p6011_p12 = scmp.lt.u32.totalorder %s6003_s25, %s7137_s11 }
 0x21a   : > { %p6005_p7 = pnand %p6004_p4, %p6114_p5 }
 0x21b   : > { %p6010_p11 = por %p6009_p10, %p6008_p9 }
 0x21c   : > { %p6006_p8 = pneg %p6005_p7 }
 0x21d   : > { %p6012_p13 = por %p6011_p12, %p6010_p11 }
 0x21f   : > { %p6013_p0 = pnand %p6012_p13, %p6006_p8 }
 0x221   : > { %6016 = shalt.err (!%p6013_p0)
}
 0x222   : > { %s6054_s4 = smov 128   ;;  %s6055_s5 = smov 8  }
 0x223   : > { %5948 = dma.vmem_to_hbm [thread:$0]  (%p6114_p5), %s7139_s8, 4096, %s7137_s11, %s7145_s16, %s6054_s4, %s6054_s4, %s6055_s5  }
 0x224 PF: > { %p5954_p1 = scmp.ge.s32.totalorder %s6051_s15, 2  ;;  %s4330_s6 = sand.u32 1, %s6039_s12  }
 0x225   : > { %s4331_s7 = scalar_lea.sflag [#allocation3], %s4330_s6 }
 0x226   : > { %p5951_p2 = pnand %p5954_p1, %p6118_p6 }
 0x228   : > { %6034 = dma.done.wait (!%p5951_p2), %s4331_s7, 4096  }
 0x229   : > { %6036 = vsyncadd (!%p5951_p2), %s4331_s7, 4294963200  ;;  %p13_p3 = scmp.ge.s32.totalorder %s6101_s18, 4   ;;  %s7280_s12 = smov %s6043_s13 }
 0x22a   : > { %s7281_s13 = smov %s6047_s14  ;;  %s7282_s14 = smov %s6112_s21 }
 0x22b   : > { %s7283_s15 = smov %s6101_s18  ;;  %15 = sbr.rel (!%p13_p3) target bundleno = 3 (0x3), region = 77 }
 0x232   :  { %4336 = vsyncpa [#allocation3], 1 }
 0x233   :  { %4338 = vsyncpa [#allocation3 + $0x1], 1 }

</bundles_post_ra>
